<compile_context>
chip_gen: v7x
topology: tpu7x:2x2x1
jax: 0.10.0
libtpu: 0.0.40
codegen_flags: <defaults>
</compile_context>

<pallas_src>
import math
import functools

import jax
import jax.numpy as jnp
from jax.experimental import pallas as pl
from jax.experimental.pallas import tpu as pltpu

MU = 5000.0
INV_LOG1P_MU = 1.0 / math.log(1.0 + MU)
_LANES = 128
_ROW_ALIGN = 16            # bf16 sublane packing minimum (16,128); also fine for f32
_TARGET_TILE_ROWS = 512    # ~85%+ of HBM roofline per measured pipelining data


def _tonemap(x):
    # torch.log(1 + mu*x) / log(1 + mu): log on the EUP, multiply by a
    # precomputed reciprocal instead of a full-size VPU divide.
    return jnp.log(1.0 + MU * x) * INV_LOG1P_MU


def backward_warp(img, flow):
    """Bilinear backward warp: sample img at (x + flow_x, y + flow_y).

    img: [B, C, H, W], flow: [B, 2, H, W] with flow[:,0]=dx, flow[:,1]=dy.
    Zero padding outside the image, pixel coordinates (align_corners=True style).
    """
    # TODO(synk): fuse this data-dependent bilinear gather into the Pallas kernel
    # (hdrs as memory_space=pl.ANY + manual row DMAs) to remove the HBM write+read
    # of the 4 warped frames; also verify coordinate-convention parity with
    # PyTorch's grid_sample-based backward_warp.
    B, C, H, W = img.shape
    xx = jnp.arange(W, dtype=jnp.float32)
    yy = jnp.arange(H, dtype=jnp.float32)
    gx = xx[None, None, :] + flow[:, 0]  # [B, H, W]
    gy = yy[None, :, None] + flow[:, 1]  # [B, H, W]

    x0 = jnp.floor(gx)
    y0 = jnp.floor(gy)
    x1 = x0 + 1.0
    y1 = y0 + 1.0
    wx1 = gx - x0
    wx0 = 1.0 - wx1
    wy1 = gy - y0
    wy0 = 1.0 - wy1

    img_flat = img.reshape(B, C, H * W)

    def sample(yc, xc):
        valid = (xc >= 0) & (xc <= W - 1) & (yc >= 0) & (yc <= H - 1)
        xi = jnp.clip(xc, 0, W - 1).astype(jnp.int32)
        yi = jnp.clip(yc, 0, H - 1).astype(jnp.int32)
        idx = (yi * W + xi).reshape(B, 1, H * W)
        idx = jnp.broadcast_to(idx, (B, C, H * W))
        g = jnp.take_along_axis(img_flat, idx, axis=2).reshape(B, C, H, W)
        return g * valid[:, None, :, :].astype(img.dtype)

    out = (sample(y0, x0) * (wy0 * wx0)[:, None]
           + sample(y0, x1) * (wy0 * wx1)[:, None]
           + sample(y1, x0) * (wy1 * wx0)[:, None]
           + sample(y1, x1) * (wy1 * wx1)[:, None])
    return out


def _loss_kernel(fw_ref, imgs_ref, flows_ref, out_ref):
    """fw_ref:    [B] int32 0/1 flow-mask weights (SMEM scalar prefetch).
       imgs_ref:  [B, 21, TR, 128]  (pred | gt | ldr | 4 warped frames), narrow dtype.
       flows_ref: [B, 16, TR, 128]  (4 flow preds | 4 flow gts), narrow dtype.
       out_ref:   [1, 4, TR, 128]   f32 per-lane accumulator (recon, mask, align, flow)."""
    t = pl.program_id(1)

    @pl.when(t == 0)
    def _init():
        out_ref[...] = jnp.zeros_like(out_ref)

    f32 = jnp.float32
    mu_pred = _tonemap(imgs_ref[:, 0:3].astype(f32))                 # [B,3,TR,128]
    mu_gt = _tonemap(imgs_ref[:, 3:6].astype(f32))
    recon_part = jnp.sum(jnp.abs(mu_pred - mu_gt), axis=(0, 1))      # [TR,128]

    # Luminance mask from the current LDR frame (per pixel, shared by 3 channels).
    ldr = imgs_ref[:, 6:9].astype(f32)
    Y = 0.299 * ldr[:, 0] + 0.587 * ldr[:, 1] + 0.114 * ldr[:, 2]    # [B,TR,128]
    mb = jnp.logical_or(Y > 0.8, Y < 0.2)                            # bool
    mask_part = jnp.sum(jnp.where(mb, 1.0, 0.0), axis=0)             # [TR,128]

    # All four align terms share mu_gt and the mask: combine before masking.
    d_align = (jnp.abs(_tonemap(imgs_ref[:, 9:12].astype(f32)) - mu_gt)
               + jnp.abs(_tonemap(imgs_ref[:, 12:15].astype(f32)) - mu_gt)
               + jnp.abs(_tonemap(imgs_ref[:, 15:18].astype(f32)) - mu_gt)
               + jnp.abs(_tonemap(imgs_ref[:, 18:21].astype(f32)) - mu_gt))
    align_part = jnp.sum(jnp.where(mb[:, None], d_align, 0.0), axis=(0, 1))

    # Flow L1, weighted per batch by the 0/1 flow mask read from SMEM.
    d_flow = (jnp.abs(flows_ref[:, 0:2].astype(f32) - flows_ref[:, 8:10].astype(f32))
              + jnp.abs(flows_ref[:, 2:4].astype(f32) - flows_ref[:, 10:12].astype(f32))
              + jnp.abs(flows_ref[:, 4:6].astype(f32) - flows_ref[:, 12:14].astype(f32))
              + jnp.abs(flows_ref[:, 6:8].astype(f32) - flows_ref[:, 14:16].astype(f32)))
    B = d_flow.shape[0]
    flow_part = jnp.zeros_like(recon_part)
    for b in range(B):   # B is tiny & static; each weighted term is only [TR,128]
        flow_part = flow_part + fw_ref[b].astype(f32) * jnp.sum(d_flow[b], axis=0)

    out_ref[0, 0] += recon_part
    out_ref[0, 1] += mask_part
    out_ref[0, 2] += align_part
    out_ref[0, 3] += flow_part


def _round_up(x, m):
    return -(-x // m) * m


def _pack_lane_dense(arrays, pad_values, rows, dtype):
    """Flatten pixels of each [B, Ci, H, W] array, cast to `dtype`, pad the pixel
    dim to rows*128 with the array's own constant, concatenate channels, and
    reshape to [B, sum(Ci), rows, 128]. Under jit this fuses with the producers
    (warp arithmetic / input casts) into one pass over the data."""
    B = arrays[0].shape[0]
    hw = arrays[0].shape[2] * arrays[0].shape[3]
    padded = rows * _LANES
    flats = []
    for a, pv in zip(arrays, pad_values):
        f = a.reshape(B, a.shape[1], hw).astype(dtype)
        if padded != hw:
            f = jnp.pad(f, ((0, 0), (0, 0), (0, padded - hw)), constant_values=pv)
        flats.append(f)
    return jnp.concatenate(flats, axis=1).reshape(B, -1, rows, _LANES)


def _vmem_capacity_bytes():
    # Generation-aware: 128 MiB on v5e/v6e, 64 MiB per TensorCore on v7x.
    try:
        return int(pltpu.get_tpu_info().vmem_capacity_bytes)
    except Exception:
        return 64 * 1024 * 1024      # conservative fallback (v7x-sized)


def hdrflow_loss_3e(pred, hdrs, flow_preds, cur_ldr, flow_mask, flow_gts, *,
                    image_dtype=jnp.bfloat16, vmem_budget_bytes=None,
                    max_tile_rows=None):
    """Forward pass of HDRFlow_Loss_3E.

    Pixel inputs are carried to the kernel in `image_dtype` (bfloat16 default;
    pass jnp.float32 for an exactly-f32 pipeline) and upcast to f32 inside the
    kernel: the kernel is HBM-bandwidth bound on every TPU generation, so
    halving bytes/pixel is the dominant win."""
    B, C, H, W = pred.shape
    assert C == 3, "HDRFlow_Loss_3E expects 3-channel HDR/LDR images"
    gt = hdrs[2]
    p2_flow, n1_flow, p1_flow, n2_flow = flow_preds

    # Backward warping of the neighbour HDR frames (plain JAX glue, see TODO above).
    w_p2 = backward_warp(hdrs[0], p2_flow)
    w_n1 = backward_warp(hdrs[3], n1_flow)
    w_p1 = backward_warp(hdrs[1], p1_flow)
    w_n2 = backward_warp(hdrs[4], n2_flow)

    # Per-row VMEM footprint: pipelined inputs (double-buffered) + in-kernel f32
    # temporaries (mu_gt / d_align / per-term upcasts ~= 16*B f32 channels) +
    # the resident f32 output accumulator (also double-buffered).
    item = jnp.dtype(image_dtype).itemsize
    in_bytes_row = (7 * 3 * B + 8 * 2 * B) * _LANES * item
    tmp_bytes_row = (16 * B + 8) * _LANES * 4
    out_bytes_row = 4 * _LANES * 4
    bytes_per_row = 2 * in_bytes_row + tmp_bytes_row + 2 * out_bytes_row

    vmem_cap = _vmem_capacity_bytes()
    if vmem_budget_bytes is None:
        budget = max(16 << 20, min(vmem_cap // 2, 56 << 20))
    else:
        budget = max(16 << 20, min(vmem_budget_bytes, vmem_cap - (8 << 20)))

    rows_raw = pl.cdiv(H * W, _LANES)
    tr = min(max(_ROW_ALIGN, (budget // bytes_per_row) // _ROW_ALIGN * _ROW_ALIGN),
             _TARGET_TILE_ROWS,
             _round_up(pl.cdiv(rows_raw, 2), _ROW_ALIGN))
    if max_tile_rows is not None:
        tr = min(tr, _round_up(max_tile_rows, _ROW_ALIGN))
    TR = max(_ROW_ALIGN, tr)

    # Pad rows so the grid always splits evenly across two TensorCores (v7x
    # megacore); on 1-TC parts the size-2 parallel axis just serialises.
    rows = _round_up(rows_raw, 2 * TR)
    P = 2
    T = (rows // TR) // P

    # Pack the 15 pixel arrays into 2 channel-stacked lane-dense HBM operands.
    # LDR pads with 0.5 so padded pixels give mask=0; all other pads are 0 and
    # contribute nothing to any |.| sum.
    imgs = _pack_lane_dense(
        [pred, gt, cur_ldr, w_p2, w_n1, w_p1, w_n2],
        [0.0, 0.0, 0.5, 0.0, 0.0, 0.0, 0.0], rows, image_dtype)
    flows = _pack_lane_dense(
        [p2_flow, n1_flow, p1_flow, n2_flow,
         flow_gts[0], flow_gts[1], flow_gts[2], flow_gts[3]],
        [0.0] * 8, rows, image_dtype)

    fw_f = (flow_mask > 0.5).astype(jnp.float32)       # [B] 0/1
    fw_i = fw_f.astype(jnp.int32)                      # scalar-prefetch operand

    def pix_map(p, t, fw):                             # fw = scalar-prefetch ref
        return (0, 0, p * T + t, 0)

    partial = pl.pallas_call(
        _loss_kernel,
        out_shape=jax.ShapeDtypeStruct((P, 4, TR, _LANES), jnp.float32),
        grid_spec=pltpu.PrefetchScalarGridSpec(
            num_scalar_prefetch=1,
            grid=(P, T),
            in_specs=[pl.BlockSpec((B, 7 * 3, TR, _LANES), pix_map),
                      pl.BlockSpec((B, 8 * 2, TR, _LANES), pix_map)],
            out_specs=pl.BlockSpec((1, 4, TR, _LANES),
                                   lambda p, t, fw: (p, 0, 0, 0))),
        compiler_params=pltpu.CompilerParams(
            dimension_semantics=("parallel", "arbitrary"),
            vmem_limit_bytes=min(vmem_cap, budget + (8 << 20))),
    )(fw_i, imgs, flows)

    # Final cross-lane reductions on one tiny [P,4,TR,128] array.
    sums = jnp.sum(partial, axis=(0, 2, 3))            # (4,)
    recon_sum, mask_sum, align_sum, flow_sum = sums[0], sums[1], sums[2], sums[3]

    mask_count = 3.0 * mask_sum                        # mask repeated over 3 channels
    flow_count = 2.0 * H * W * jnp.sum(fw_f)           # flow_mask repeated (2,H,W)

    recon_loss = recon_sum / (B * C * H * W)
    # `if mask.sum() > 0:` / `if flow_mask.sum() > 0:` emulated with where().
    align_term = jnp.where(mask_count > 0,
                           0.2 * align_sum / jnp.maximum(mask_count, 1.0), 0.0)
    flow_term = jnp.where(flow_count > 0,
                          0.0005 * flow_sum / jnp.maximum(flow_count, 1.0), 0.0)
    return recon_loss + align_term + flow_term


def _reference_loss(pred, hdrs, flow_preds, cur_ldr, flow_mask, flow_gts,
                    image_dtype=jnp.float32):
    """Pure-JAX mirror of the PyTorch module (same backward_warp); `image_dtype`
    applies the same storage quantisation as the kernel path."""
    def q(x):
        return x.astype(image_dtype).astype(jnp.float32)

    gt = q(hdrs[2])
    mu_pred = _tonemap(q(pred))
    mu_gt = _tonemap(gt)
    loss = jnp.mean(jnp.abs(mu_pred - mu_gt))
    ldr = q(cur_ldr)
    Y = 0.299 * ldr[:, 0] + 0.587 * ldr[:, 1] + 0.114 * ldr[:, 2]
    mask = ((Y > 0.8) | (Y < 0.2))[:, None]
    mask3 = jnp.broadcast_to(mask, mu_gt.shape).astype(jnp.float32)
    msum = jnp.sum(mask3)
    p2, n1, p1, n2 = flow_preds
    warps = [q(backward_warp(hdrs[0], p2)), q(backward_warp(hdrs[3], n1)),
             q(backward_warp(hdrs[1], p1)), q(backward_warp(hdrs[4], n2))]
    align = sum(jnp.sum(jnp.abs(_tonemap(w) - mu_gt) * mask3) for w in warps)
    loss = loss + jnp.where(msum > 0, 0.2 * align / jnp.maximum(msum, 1.0), 0.0)
    b, c, h, w = p2.shape
    fm = (flow_mask > 0.5).astype(jnp.float32)
    fcount = 2.0 * h * w * jnp.sum(fm)
    fsum = sum(jnp.sum(jnp.abs(q(fp) - q(fg)) * fm[:, None, None, None])
               for fp, fg in zip(flow_preds, flow_gts))
    loss = loss + jnp.where(fcount > 0,
                            0.0005 * fsum / jnp.maximum(fcount, 1.0), 0.0)
    return loss


if __name__ == "__main__":
    key = jax.random.PRNGKey(0)
    B, C, H, W = 2, 3, 96, 96
    ks = jax.random.split(key, 16)

    pred = jax.random.uniform(ks[0], (B, C, H, W), jnp.float32, 0.0, 2.0)
    hdrs = [jax.random.uniform(ks[1 + i], (B, C, H, W), jnp.float32, 0.0, 2.0)
            for i in range(5)]
    flow_preds = tuple(
        1.5 * jax.random.normal(ks[6 + i], (B, 2, H, W), jnp.float32)
        for i in range(4))
    flow_gts = [
        1.5 * jax.random.normal(ks[10 + i], (B, 2, H, W), jnp.float32)
        for i in range(4)]
    cur_ldr = jax.random.uniform(ks[14], (B, C, H, W), jnp.float32)
    flow_mask = jnp.array([1.0, 0.0], dtype=jnp.float32)

    # max_tile_rows=16 forces a (2, 3) grid at this small demo size so the tiled,
    # pipelined, dual-core-split, accumulate-over-t path is all exercised.
    loss_fn = jax.jit(functools.partial(hdrflow_loss_3e, max_tile_rows=16))
    loss = jax.block_until_ready(
        loss_fn(pred, hdrs, flow_preds, cur_ldr, flow_mask, flow_gts))

    # Reference with the same bf16 storage quantisation (tight match) ...
    ref_q = jax.block_until_ready(_reference_loss(
        pred, hdrs, flow_preds, cur_ldr, flow_mask, flow_gts,
        image_dtype=jnp.bfloat16))
    # ... and the all-f32 PyTorch-equivalent reference (loose match: the only
    # difference is the bf16 carrier dtype of the pixel inputs).
    ref_f32 = jax.block_until_ready(_reference_loss(
        pred, hdrs, flow_preds, cur_ldr, flow_mask, flow_gts,
        image_dtype=jnp.float32))

    assert jnp.isfinite(loss), "loss is not finite"
    assert jnp.allclose(loss, ref_q, rtol=1e-3, atol=1e-5), (loss, ref_q)
    assert jnp.allclose(loss, ref_f32, rtol=2e-2, atol=1e-4), (loss, ref_f32)
    print("KERNEL_OK")
</pallas_src>

<mosaic_0001>
module attributes {stable_mosaic.version = 11 : i64} {
  func.func private @main(%arg0: i32) attributes {dimension_semantics = [#tpu.dimension_semantics<core_parallel>], iteration_bounds = array<i64: 2>, tpu.core_type = #tpu.core_type<sc_scalar_subcore>, window_params = []} {
    return
  }
}

module attributes {stable_mosaic.version = 11 : i64} {
  func.func private @main(%arg0: i32) attributes {dimension_semantics = [#tpu.dimension_semantics<core_parallel>], iteration_bounds = array<i64: 2>, tpu.core_type = #tpu.core_type<sc_scalar_subcore>, window_params = []} {
    return
  }
}

module attributes {stable_mosaic.version = 11 : i64} {
  func.func @_loss_kernel(%arg0: i32, %arg1: i32, %arg2: memref<2xi32, #tpu.memory_space<smem>>, %arg3: memref<2x21x16x128xbf16, #tpu.memory_space<vmem>>, %arg4: memref<2x16x16x128xbf16, #tpu.memory_space<vmem>>, %arg5: memref<1x4x16x128xf32, #tpu.memory_space<vmem>>) attributes {dimension_semantics = [#tpu.dimension_semantics<parallel>, #tpu.dimension_semantics<arbitrary>], iteration_bounds = array<i64: 2, 3>, scalar_prefetch = 1 : i64, scratch_operands = 0 : i64, tpu.core_type = #tpu.core_type<tc>, window_params = [{transform_indices = @transform_0, window_bounds = array<i64: 2, 21, 16, 128>}, {transform_indices = @transform_1, window_bounds = array<i64: 2, 16, 16, 128>}, {transform_indices = @transform_2, window_bounds = array<i64: 1, 4, 16, 128>}]} {
    %c0_i32 = arith.constant 0 : i32
    %0 = arith.cmpi eq, %arg1, %c0_i32 : i32
    %1 = arith.extui %0 : i1 to i32
    %c0_i32_0 = arith.constant 0 : i32
    %2 = arith.cmpi ne, %1, %c0_i32_0 : i32
    scf.if %2 {
      %cst_113 = arith.constant 0.000000e+00 : f32
      %170 = vector.broadcast %cst_113 : f32 to vector<1x4x16x128xf32>
      %c0_114 = arith.constant 0 : index
      %c0_115 = arith.constant 0 : index
      %c0_116 = arith.constant 0 : index
      %c0_117 = arith.constant 0 : index
      %171 = vector.load %arg5[%c0_114, %c0_115, %c0_116, %c0_117] : memref<1x4x16x128xf32, #tpu.memory_space<vmem>>, vector<1x4x16x128xf32>
      tpu.vector_store %arg5[%c0_114, %c0_115, %c0_116, %c0_117], %170 {strides = array<i32>} : memref<1x4x16x128xf32, #tpu.memory_space<vmem>>, vector<1x4x16x128xf32>,
    } else {
    }
    %c0 = arith.constant 0 : index
    %c0_1 = arith.constant 0 : index
    %c0_2 = arith.constant 0 : index
    %c0_3 = arith.constant 0 : index
    %3 = vector.load %arg3[%c0, %c0_1, %c0_2, %c0_3] : memref<2x21x16x128xbf16, #tpu.memory_space<vmem>>, vector<2x3x16x128xbf16>
    %4 = arith.extf %3 : vector<2x3x16x128xbf16> to vector<2x3x16x128xf32>
    %cst = arith.constant 5.000000e+03 : f32
    %5 = vector.broadcast %cst : f32 to vector<2x3x16x128xf32>
    %6 = arith.mulf %5, %4 : vector<2x3x16x128xf32>
    %cst_4 = arith.constant 1.000000e+00 : f32
    %7 = vector.broadcast %cst_4 : f32 to vector<2x3x16x128xf32>
    %8 = arith.addf %7, %6 : vector<2x3x16x128xf32>
    %9 = math.log %8 : vector<2x3x16x128xf32>
    %cst_5 = arith.constant 0.117406815 : f32
    %10 = vector.broadcast %cst_5 : f32 to vector<2x3x16x128xf32>
    %11 = arith.mulf %9, %10 : vector<2x3x16x128xf32>
    %c0_6 = arith.constant 0 : index
    %c3 = arith.constant 3 : index
    %c0_7 = arith.constant 0 : index
    %c0_8 = arith.constant 0 : index
    %12 = vector.load %arg3[%c0_6, %c3, %c0_7, %c0_8] : memref<2x21x16x128xbf16, #tpu.memory_space<vmem>>, vector<2x3x16x128xbf16>
    %13 = arith.extf %12 : vector<2x3x16x128xbf16> to vector<2x3x16x128xf32>
    %cst_9 = arith.constant 5.000000e+03 : f32
    %14 = vector.broadcast %cst_9 : f32 to vector<2x3x16x128xf32>
    %15 = arith.mulf %14, %13 : vector<2x3x16x128xf32>
    %cst_10 = arith.constant 1.000000e+00 : f32
    %16 = vector.broadcast %cst_10 : f32 to vector<2x3x16x128xf32>
    %17 = arith.addf %16, %15 : vector<2x3x16x128xf32>
    %18 = math.log %17 : vector<2x3x16x128xf32>
    %cst_11 = arith.constant 0.117406815 : f32
    %19 = vector.broadcast %cst_11 : f32 to vector<2x3x16x128xf32>
    %20 = arith.mulf %18, %19 : vector<2x3x16x128xf32>
    %21 = arith.subf %11, %20 : vector<2x3x16x128xf32>
    %22 = math.absf %21 : vector<2x3x16x128xf32>
    %cst_12 = arith.constant dense<0.000000e+00> : vector<16x128xf32>
    %23 = vector.multi_reduction <add>, %22, %cst_12 [0, 1] : vector<2x3x16x128xf32> to vector<16x128xf32>
    %c0_13 = arith.constant 0 : index
    %c6 = arith.constant 6 : index
    %c0_14 = arith.constant 0 : index
    %c0_15 = arith.constant 0 : index
    %24 = vector.load %arg3[%c0_13, %c6, %c0_14, %c0_15] : memref<2x21x16x128xbf16, #tpu.memory_space<vmem>>, vector<2x3x16x128xbf16>
    %25 = arith.extf %24 : vector<2x3x16x128xbf16> to vector<2x3x16x128xf32>
    %26 = vector.extract_strided_slice %25 {offsets = [0, 0, 0, 0], sizes = [2, 1, 16, 128], strides = [1, 1, 1, 1]} : vector<2x3x16x128xf32> to vector<2x1x16x128xf32>
    %27 = vector.shape_cast %26 : vector<2x1x16x128xf32> to vector<2x16x128xf32>
    %cst_16 = arith.constant 2.990000e-01 : f32
    %28 = vector.broadcast %cst_16 : f32 to vector<2x16x128xf32>
    %29 = arith.mulf %28, %27 : vector<2x16x128xf32>
    %30 = vector.extract_strided_slice %25 {offsets = [0, 1, 0, 0], sizes = [2, 1, 16, 128], strides = [1, 1, 1, 1]} : vector<2x3x16x128xf32> to vector<2x1x16x128xf32>
    %31 = vector.shape_cast %30 : vector<2x1x16x128xf32> to vector<2x16x128xf32>
    %cst_17 = arith.constant 5.870000e-01 : f32
    %32 = vector.broadcast %cst_17 : f32 to vector<2x16x128xf32>
    %33 = arith.mulf %32, %31 : vector<2x16x128xf32>
    %34 = arith.addf %29, %33 : vector<2x16x128xf32>
    %35 = vector.extract_strided_slice %25 {offsets = [0, 2, 0, 0], sizes = [2, 1, 16, 128], strides = [1, 1, 1, 1]} : vector<2x3x16x128xf32> to vector<2x1x16x128xf32>
    %36 = vector.shape_cast %35 : vector<2x1x16x128xf32> to vector<2x16x128xf32>
    %cst_18 = arith.constant 1.140000e-01 : f32
    %37 = vector.broadcast %cst_18 : f32 to vector<2x16x128xf32>
    %38 = arith.mulf %37, %36 : vector<2x16x128xf32>
    %39 = arith.addf %34, %38 : vector<2x16x128xf32>
    %cst_19 = arith.constant 8.000000e-01 : f32
    %40 = vector.broadcast %cst_19 : f32 to vector<2x16x128xf32>
    %41 = arith.cmpf ogt, %39, %40 : vector<2x16x128xf32>
    %cst_20 = arith.constant 2.000000e-01 : f32
    %42 = vector.broadcast %cst_20 : f32 to vector<2x16x128xf32>
    %43 = arith.cmpf olt, %39, %42 : vector<2x16x128xf32>
    %44 = arith.ori %41, %43 : vector<2x16x128xi1>
    %cst_21 = arith.constant 1.000000e+00 : f32
    %cst_22 = arith.constant 0.000000e+00 : f32
    %45 = vector.broadcast %cst_21 : f32 to vector<2x16x128xf32>
    %46 = vector.broadcast %cst_22 : f32 to vector<2x16x128xf32>
    %47 = arith.select %44, %45, %46 : vector<2x16x128xi1>, vector<2x16x128xf32>
    %cst_23 = arith.constant dense<0.000000e+00> : vector<16x128xf32>
    %48 = vector.multi_reduction <add>, %47, %cst_23 [0] : vector<2x16x128xf32> to vector<16x128xf32>
    %c0_24 = arith.constant 0 : index
    %c9 = arith.constant 9 : index
    %c0_25 = arith.constant 0 : index
    %c0_26 = arith.constant 0 : index
    %49 = vector.load %arg3[%c0_24, %c9, %c0_25, %c0_26] : memref<2x21x16x128xbf16, #tpu.memory_space<vmem>>, vector<2x3x16x128xbf16>
    %50 = arith.extf %49 : vector<2x3x16x128xbf16> to vector<2x3x16x128xf32>
    %cst_27 = arith.constant 5.000000e+03 : f32
    %51 = vector.broadcast %cst_27 : f32 to vector<2x3x16x128xf32>
    %52 = arith.mulf %51, %50 : vector<2x3x16x128xf32>
    %cst_28 = arith.constant 1.000000e+00 : f32
    %53 = vector.broadcast %cst_28 : f32 to vector<2x3x16x128xf32>
    %54 = arith.addf %53, %52 : vector<2x3x16x128xf32>
    %55 = math.log %54 : vector<2x3x16x128xf32>
    %cst_29 = arith.constant 0.117406815 : f32
    %56 = vector.broadcast %cst_29 : f32 to vector<2x3x16x128xf32>
    %57 = arith.mulf %55, %56 : vector<2x3x16x128xf32>
    %58 = arith.subf %57, %20 : vector<2x3x16x128xf32>
    %59 = math.absf %58 : vector<2x3x16x128xf32>
    %c0_30 = arith.constant 0 : index
    %c12 = arith.constant 12 : index
    %c0_31 = arith.constant 0 : index
    %c0_32 = arith.constant 0 : index
    %60 = vector.load %arg3[%c0_30, %c12, %c0_31, %c0_32] : memref<2x21x16x128xbf16, #tpu.memory_space<vmem>>, vector<2x3x16x128xbf16>
    %61 = arith.extf %60 : vector<2x3x16x128xbf16> to vector<2x3x16x128xf32>
    %cst_33 = arith.constant 5.000000e+03 : f32
    %62 = vector.broadcast %cst_33 : f32 to vector<2x3x16x128xf32>
    %63 = arith.mulf %62, %61 : vector<2x3x16x128xf32>
    %cst_34 = arith.constant 1.000000e+00 : f32
    %64 = vector.broadcast %cst_34 : f32 to vector<2x3x16x128xf32>
    %65 = arith.addf %64, %63 : vector<2x3x16x128xf32>
    %66 = math.log %65 : vector<2x3x16x128xf32>
    %cst_35 = arith.constant 0.117406815 : f32
    %67 = vector.broadcast %cst_35 : f32 to vector<2x3x16x128xf32>
    %68 = arith.mulf %66, %67 : vector<2x3x16x128xf32>
    %69 = arith.subf %68, %20 : vector<2x3x16x128xf32>
    %70 = math.absf %69 : vector<2x3x16x128xf32>
    %71 = arith.addf %59, %70 : vector<2x3x16x128xf32>
    %c0_36 = arith.constant 0 : index
    %c15 = arith.constant 15 : index
    %c0_37 = arith.constant 0 : index
    %c0_38 = arith.constant 0 : index
    %72 = vector.load %arg3[%c0_36, %c15, %c0_37, %c0_38] : memref<2x21x16x128xbf16, #tpu.memory_space<vmem>>, vector<2x3x16x128xbf16>
    %73 = arith.extf %72 : vector<2x3x16x128xbf16> to vector<2x3x16x128xf32>
    %cst_39 = arith.constant 5.000000e+03 : f32
    %74 = vector.broadcast %cst_39 : f32 to vector<2x3x16x128xf32>
    %75 = arith.mulf %74, %73 : vector<2x3x16x128xf32>
    %cst_40 = arith.constant 1.000000e+00 : f32
    %76 = vector.broadcast %cst_40 : f32 to vector<2x3x16x128xf32>
    %77 = arith.addf %76, %75 : vector<2x3x16x128xf32>
    %78 = math.log %77 : vector<2x3x16x128xf32>
    %cst_41 = arith.constant 0.117406815 : f32
    %79 = vector.broadcast %cst_41 : f32 to vector<2x3x16x128xf32>
    %80 = arith.mulf %78, %79 : vector<2x3x16x128xf32>
    %81 = arith.subf %80, %20 : vector<2x3x16x128xf32>
    %82 = math.absf %81 : vector<2x3x16x128xf32>
    %83 = arith.addf %71, %82 : vector<2x3x16x128xf32>
    %c0_42 = arith.constant 0 : index
    %c18 = arith.constant 18 : index
    %c0_43 = arith.constant 0 : index
    %c0_44 = arith.constant 0 : index
    %84 = vector.load %arg3[%c0_42, %c18, %c0_43, %c0_44] : memref<2x21x16x128xbf16, #tpu.memory_space<vmem>>, vector<2x3x16x128xbf16>
    %85 = arith.extf %84 : vector<2x3x16x128xbf16> to vector<2x3x16x128xf32>
    %cst_45 = arith.constant 5.000000e+03 : f32
    %86 = vector.broadcast %cst_45 : f32 to vector<2x3x16x128xf32>
    %87 = arith.mulf %86, %85 : vector<2x3x16x128xf32>
    %cst_46 = arith.constant 1.000000e+00 : f32
    %88 = vector.broadcast %cst_46 : f32 to vector<2x3x16x128xf32>
    %89 = arith.addf %88, %87 : vector<2x3x16x128xf32>
    %90 = math.log %89 : vector<2x3x16x128xf32>
    %cst_47 = arith.constant 0.117406815 : f32
    %91 = vector.broadcast %cst_47 : f32 to vector<2x3x16x128xf32>
    %92 = arith.mulf %90, %91 : vector<2x3x16x128xf32>
    %93 = arith.subf %92, %20 : vector<2x3x16x128xf32>
    %94 = math.absf %93 : vector<2x3x16x128xf32>
    %95 = arith.addf %83, %94 : vector<2x3x16x128xf32>
    %96 = vector.shape_cast %44 : vector<2x16x128xi1> to vector<2x1x16x128xi1>
    %cst_48 = arith.constant 0.000000e+00 : f32
    %97 = vector.shape_cast %96 : vector<2x1x16x128xi1> to vector<2x1x16x128xi1>
    %98 = vector.broadcast %97 : vector<2x1x16x128xi1> to vector<2x3x16x128xi1>
    %99 = vector.broadcast %cst_48 : f32 to vector<2x3x16x128xf32>
    %100 = arith.select %98, %95, %99 : vector<2x3x16x128xi1>, vector<2x3x16x128xf32>
    %cst_49 = arith.constant dense<0.000000e+00> : vector<16x128xf32>
    %101 = vector.multi_reduction <add>, %100, %cst_49 [0, 1] : vector<2x3x16x128xf32> to vector<16x128xf32>
    %c0_50 = arith.constant 0 : index
    %c0_51 = arith.constant 0 : index
    %c0_52 = arith.constant 0 : index
    %c0_53 = arith.constant 0 : index
    %102 = vector.load %arg4[%c0_50, %c0_51, %c0_52, %c0_53] : memref<2x16x16x128xbf16, #tpu.memory_space<vmem>>, vector<2x2x16x128xbf16>
    %103 = arith.extf %102 : vector<2x2x16x128xbf16> to vector<2x2x16x128xf32>
    %c0_54 = arith.constant 0 : index
    %c8 = arith.constant 8 : index
    %c0_55 = arith.constant 0 : index
    %c0_56 = arith.constant 0 : index
    %104 = vector.load %arg4[%c0_54, %c8, %c0_55, %c0_56] : memref<2x16x16x128xbf16, #tpu.memory_space<vmem>>, vector<2x2x16x128xbf16>
    %105 = arith.extf %104 : vector<2x2x16x128xbf16> to vector<2x2x16x128xf32>
    %106 = arith.subf %103, %105 : vector<2x2x16x128xf32>
    %107 = math.absf %106 : vector<2x2x16x128xf32>
    %c0_57 = arith.constant 0 : index
    %c2 = arith.constant 2 : index
    %c0_58 = arith.constant 0 : index
    %c0_59 = arith.constant 0 : index
    %108 = vector.load %arg4[%c0_57, %c2, %c0_58, %c0_59] : memref<2x16x16x128xbf16, #tpu.memory_space<vmem>>, vector<2x2x16x128xbf16>
    %109 = arith.extf %108 : vector<2x2x16x128xbf16> to vector<2x2x16x128xf32>
    %c0_60 = arith.constant 0 : index
    %c10 = arith.constant 10 : index
    %c0_61 = arith.constant 0 : index
    %c0_62 = arith.constant 0 : index
    %110 = vector.load %arg4[%c0_60, %c10, %c0_61, %c0_62] : memref<2x16x16x128xbf16, #tpu.memory_space<vmem>>, vector<2x2x16x128xbf16>
    %111 = arith.extf %110 : vector<2x2x16x128xbf16> to vector<2x2x16x128xf32>
    %112 = arith.subf %109, %111 : vector<2x2x16x128xf32>
    %113 = math.absf %112 : vector<2x2x16x128xf32>
    %114 = arith.addf %107, %113 : vector<2x2x16x128xf32>
    %c0_63 = arith.constant 0 : index
    %c4 = arith.constant 4 : index
    %c0_64 = arith.constant 0 : index
    %c0_65 = arith.constant 0 : index
    %115 = vector.load %arg4[%c0_63, %c4, %c0_64, %c0_65] : memref<2x16x16x128xbf16, #tpu.memory_space<vmem>>, vector<2x2x16x128xbf16>
    %116 = arith.extf %115 : vector<2x2x16x128xbf16> to vector<2x2x16x128xf32>
    %c0_66 = arith.constant 0 : index
    %c12_67 = arith.constant 12 : index
    %c0_68 = arith.constant 0 : index
    %c0_69 = arith.constant 0 : index
    %117 = vector.load %arg4[%c0_66, %c12_67, %c0_68, %c0_69] : memref<2x16x16x128xbf16, #tpu.memory_space<vmem>>, vector<2x2x16x128xbf16>
    %118 = arith.extf %117 : vector<2x2x16x128xbf16> to vector<2x2x16x128xf32>
    %119 = arith.subf %116, %118 : vector<2x2x16x128xf32>
    %120 = math.absf %119 : vector<2x2x16x128xf32>
    %121 = arith.addf %114, %120 : vector<2x2x16x128xf32>
    %c0_70 = arith.constant 0 : index
    %c6_71 = arith.constant 6 : index
    %c0_72 = arith.constant 0 : index
    %c0_73 = arith.constant 0 : index
    %122 = vector.load %arg4[%c0_70, %c6_71, %c0_72, %c0_73] : memref<2x16x16x128xbf16, #tpu.memory_space<vmem>>, vector<2x2x16x128xbf16>
    %123 = arith.extf %122 : vector<2x2x16x128xbf16> to vector<2x2x16x128xf32>
    %c0_74 = arith.constant 0 : index
    %c14 = arith.constant 14 : index
    %c0_75 = arith.constant 0 : index
    %c0_76 = arith.constant 0 : index
    %124 = vector.load %arg4[%c0_74, %c14, %c0_75, %c0_76] : memref<2x16x16x128xbf16, #tpu.memory_space<vmem>>, vector<2x2x16x128xbf16>
    %125 = arith.extf %124 : vector<2x2x16x128xbf16> to vector<2x2x16x128xf32>
    %126 = arith.subf %123, %125 : vector<2x2x16x128xf32>
    %127 = math.absf %126 : vector<2x2x16x128xf32>
    %128 = arith.addf %121, %127 : vector<2x2x16x128xf32>
    %cst_77 = arith.constant 0.000000e+00 : f32
    %129 = vector.broadcast %cst_77 : f32 to vector<16x128xf32>
    %c0_78 = arith.constant 0 : index
    %130 = memref.load %arg2[%c0_78] : memref<2xi32, #tpu.memory_space<smem>>
    %131 = arith.sitofp %130 : i32 to f32
    %132 = vector.extract_strided_slice %128 {offsets = [0, 0, 0, 0], sizes = [1, 2, 16, 128], strides = [1, 1, 1, 1]} : vector<2x2x16x128xf32> to vector<1x2x16x128xf32>
    %133 = vector.shape_cast %132 : vector<1x2x16x128xf32> to vector<2x16x128xf32>
    %cst_79 = arith.constant dense<0.000000e+00> : vector<16x128xf32>
    %134 = vector.multi_reduction <add>, %133, %cst_79 [0] : vector<2x16x128xf32> to vector<16x128xf32>
    %135 = vector.broadcast %131 : f32 to vector<16x128xf32>
    %136 = arith.mulf %135, %134 : vector<16x128xf32>
    %137 = arith.addf %129, %136 : vector<16x128xf32>
    %c1 = arith.constant 1 : index
    %138 = memref.load %arg2[%c1] : memref<2xi32, #tpu.memory_space<smem>>
    %139 = arith.sitofp %138 : i32 to f32
    %140 = vector.extract_strided_slice %128 {offsets = [1, 0, 0, 0], sizes = [1, 2, 16, 128], strides = [1, 1, 1, 1]} : vector<2x2x16x128xf32> to vector<1x2x16x128xf32>
    %141 = vector.shape_cast %140 : vector<1x2x16x128xf32> to vector<2x16x128xf32>
    %cst_80 = arith.constant dense<0.000000e+00> : vector<16x128xf32>
    %142 = vector.multi_reduction <add>, %141, %cst_80 [0] : vector<2x16x128xf32> to vector<16x128xf32>
    %143 = vector.broadcast %139 : f32 to vector<16x128xf32>
    %144 = arith.mulf %143, %142 : vector<16x128xf32>
    %145 = arith.addf %137, %144 : vector<16x128xf32>
    %c0_81 = arith.constant 0 : index
    %c0_82 = arith.constant 0 : index
    %c0_83 = arith.constant 0 : index
    %c0_84 = arith.constant 0 : index
    %146 = vector.load %arg5[%c0_81, %c0_82, %c0_83, %c0_84] : memref<1x4x16x128xf32, #tpu.memory_space<vmem>>, vector<1x1x16x128xf32>
    %147 = vector.shape_cast %146 : vector<1x1x16x128xf32> to vector<16x128xf32>
    %148 = arith.addf %147, %23 : vector<16x128xf32>
    %c0_85 = arith.constant 0 : index
    %c0_86 = arith.constant 0 : index
    %c0_87 = arith.constant 0 : index
    %c0_88 = arith.constant 0 : index
    %149 = vector.load %arg5[%c0_85, %c0_86, %c0_87, %c0_88] : memref<1x4x16x128xf32, #tpu.memory_space<vmem>>, vector<1x1x16x128xf32>
    %150 = vector.shape_cast %149 : vector<1x1x16x128xf32> to vector<16x128xf32>
    %151 = vector.shape_cast %148 : vector<16x128xf32> to vector<1x1x16x128xf32>
    tpu.vector_store %arg5[%c0_85, %c0_86, %c0_87, %c0_88], %151 {strides = array<i32>} : memref<1x4x16x128xf32, #tpu.memory_space<vmem>>, vector<1x1x16x128xf32>,
    %c0_89 = arith.constant 0 : index
    %c1_90 = arith.constant 1 : index
    %c0_91 = arith.constant 0 : index
    %c0_92 = arith.constant 0 : index
    %152 = vector.load %arg5[%c0_89, %c1_90, %c0_91, %c0_92] : memref<1x4x16x128xf32, #tpu.memory_space<vmem>>, vector<1x1x16x128xf32>
    %153 = vector.shape_cast %152 : vector<1x1x16x128xf32> to vector<16x128xf32>
    %154 = arith.addf %153, %48 : vector<16x128xf32>
    %c0_93 = arith.constant 0 : index
    %c1_94 = arith.constant 1 : index
    %c0_95 = arith.constant 0 : index
    %c0_96 = arith.constant 0 : index
    %155 = vector.load %arg5[%c0_93, %c1_94, %c0_95, %c0_96] : memref<1x4x16x128xf32, #tpu.memory_space<vmem>>, vector<1x1x16x128xf32>
    %156 = vector.shape_cast %155 : vector<1x1x16x128xf32> to vector<16x128xf32>
    %157 = vector.shape_cast %154 : vector<16x128xf32> to vector<1x1x16x128xf32>
    tpu.vector_store %arg5[%c0_93, %c1_94, %c0_95, %c0_96], %157 {strides = array<i32>} : memref<1x4x16x128xf32, #tpu.memory_space<vmem>>, vector<1x1x16x128xf32>,
    %c0_97 = arith.constant 0 : index
    %c2_98 = arith.constant 2 : index
    %c0_99 = arith.constant 0 : index
    %c0_100 = arith.constant 0 : index
    %158 = vector.load %arg5[%c0_97, %c2_98, %c0_99, %c0_100] : memref<1x4x16x128xf32, #tpu.memory_space<vmem>>, vector<1x1x16x128xf32>
    %159 = vector.shape_cast %158 : vector<1x1x16x128xf32> to vector<16x128xf32>
    %160 = arith.addf %159, %101 : vector<16x128xf32>
    %c0_101 = arith.constant 0 : index
    %c2_102 = arith.constant 2 : index
    %c0_103 = arith.constant 0 : index
    %c0_104 = arith.constant 0 : index
    %161 = vector.load %arg5[%c0_101, %c2_102, %c0_103, %c0_104] : memref<1x4x16x128xf32, #tpu.memory_space<vmem>>, vector<1x1x16x128xf32>
    %162 = vector.shape_cast %161 : vector<1x1x16x128xf32> to vector<16x128xf32>
    %163 = vector.shape_cast %160 : vector<16x128xf32> to vector<1x1x16x128xf32>
    tpu.vector_store %arg5[%c0_101, %c2_102, %c0_103, %c0_104], %163 {strides = array<i32>} : memref<1x4x16x128xf32, #tpu.memory_space<vmem>>, vector<1x1x16x128xf32>,
    %c0_105 = arith.constant 0 : index
    %c3_106 = arith.constant 3 : index
    %c0_107 = arith.constant 0 : index
    %c0_108 = arith.constant 0 : index
    %164 = vector.load %arg5[%c0_105, %c3_106, %c0_107, %c0_108] : memref<1x4x16x128xf32, #tpu.memory_space<vmem>>, vector<1x1x16x128xf32>
    %165 = vector.shape_cast %164 : vector<1x1x16x128xf32> to vector<16x128xf32>
    %166 = arith.addf %165, %145 : vector<16x128xf32>
    %c0_109 = arith.constant 0 : index
    %c3_110 = arith.constant 3 : index
    %c0_111 = arith.constant 0 : index
    %c0_112 = arith.constant 0 : index
    %167 = vector.load %arg5[%c0_109, %c3_110, %c0_111, %c0_112] : memref<1x4x16x128xf32, #tpu.memory_space<vmem>>, vector<1x1x16x128xf32>
    %168 = vector.shape_cast %167 : vector<1x1x16x128xf32> to vector<16x128xf32>
    %169 = vector.shape_cast %166 : vector<16x128xf32> to vector<1x1x16x128xf32>
    tpu.vector_store %arg5[%c0_109, %c3_110, %c0_111, %c0_112], %169 {strides = array<i32>} : memref<1x4x16x128xf32, #tpu.memory_space<vmem>>, vector<1x1x16x128xf32>,
    return
  }
  func.func @transform_0(%arg0: i32, %arg1: i32, %arg2: memref<2xi32, #tpu.memory_space<smem>>) -> (i32, i32, i32, i32) {
    %c3_i32 = arith.constant 3 : i32
    %0 = arith.muli %arg0, %c3_i32 : i32
    %1 = arith.addi %0, %arg1 : i32
    %c0_i32 = arith.constant 0 : i32
    %c0_i32_0 = arith.constant 0 : i32
    %c0_i32_1 = arith.constant 0 : i32
    %c0_i32_2 = arith.constant 0 : i32
    return %c0_i32, %c0_i32_0, %1, %c0_i32_1 : i32, i32, i32, i32
  }
  func.func @transform_1(%arg0: i32, %arg1: i32, %arg2: memref<2xi32, #tpu.memory_space<smem>>) -> (i32, i32, i32, i32) {
    %c3_i32 = arith.constant 3 : i32
    %0 = arith.muli %arg0, %c3_i32 : i32
    %1 = arith.addi %0, %arg1 : i32
    %c0_i32 = arith.constant 0 : i32
    %c0_i32_0 = arith.constant 0 : i32
    %c0_i32_1 = arith.constant 0 : i32
    %c0_i32_2 = arith.constant 0 : i32
    return %c0_i32, %c0_i32_0, %1, %c0_i32_1 : i32, i32, i32, i32
  }
  func.func @transform_2(%arg0: i32, %arg1: i32, %arg2: memref<2xi32, #tpu.memory_space<smem>>) -> (i32, i32, i32, i32) {
    %c0_i32 = arith.constant 0 : i32
    %c0_i32_0 = arith.constant 0 : i32
    %c0_i32_1 = arith.constant 0 : i32
    %c0_i32_2 = arith.constant 0 : i32
    return %arg0, %c0_i32, %c0_i32_0, %c0_i32_1 : i32, i32, i32, i32
  }
}

</mosaic_0001>

<bundles_post_ra>
// kernel: hdrflow_loss_3e.1
= control target key start
LH: loop header
LB: loop body
LE: loop exit
PB: predicated region body
PF: predicated region fallthrough
CT: control target
= control target key end

     0   :  { %s3662_s0 = inlined_call_operand.vmem [shape: s32[2], index: 0, kind: input, shape index: {}]   ;;  %s3663_s1 = inlined_call_operand.vmem [shape: bf16[2,21,96,128], index: 1, kind: input, shape index: {}]   ;;  %s3664_s2 = inlined_call_operand.vmem [shape: bf16[2,16,96,128], index: 2, kind: input, shape index: {}]   ;;  %s3665_s3 = inlined_call_operand.vmem [shape: f32[2,4,16,128], index: 3, kind: output, shape index: {}]  }
   0x1   :  { %s8_s14 = sshll.u32 %s3662_s0, 4  ;;  %s9_s14 = int_to_ptr.vmem [resolvable:$true] %s8_s14 }
   0x2   :  { %s2744_s15 = scalar_lea.vmem %s9_s14, 16  ;;  %p2749_p1 = scmp.lt.s32.totalorder %s9_s14, %s9_s14 }
   0x3   :  { %p2745_p0 = scmp.ne.s32.totalorder %s9_s14, %s2744_s15  ;;  %p2750_p2 = scmp.lt.s32.totalorder %s2744_s15, %s2744_s15 }
   0x5   :  { %p2751_p3 = por %p2750_p2, %p2749_p1 }
   0x7   :  { %p2752_p4 = pnand %p2751_p3, %p2745_p0 }
   0x9   :  { %2755 = shalt.err (!%p2752_p4)  }
   0xa   :  { %s2814_s16 = smov [#allocation3]  }
   0xb   :  { %11 = dma.vmem_to_smem %s9_s14, 16, %s2814_s16, [#allocation2] }
   0xc   :  { %2784 = dma.done.wait [#allocation2], 16 }
   0xd   :  { %2785 = vsyncadd [#allocation2], 4294967280 }
   0xe   :  { %13 = sfence }
   0xf   :  { %s2840_s17 = smov 0   ;;  %s2842_s18 = smov 0  }
  0x10   :  { %s2844_s19 = smov 0   ;;  %s2846_s0 = smov 0  }
  0x11   :  { %s2848_s20 = smov 0   ;;  %s2850_s21 = smov 0  }
  0x12   :  { %s2852_s22 = smov 0  }
  0x13 LB: > { %s28_s23 = sadd.s32 1, %s2804_s20  ;;  %s31_s24 = sadd.s32 1, %s2808_s21  ;;  %s2812_s22 = sphi %s2852_s22, %s19_s22   ;;  %s2808_s21 = sphi %s2850_s21, %s3695_s21   ;;  %s2804_s20 = sphi %s2848_s20, %s3694_s20   ;;  %s2800_s0 = sphi %s2846_s0, %s3693_s0   ;;  %s2796_s19 = sphi %s2844_s19, %s3692_s19   ;;  %s2792_s18 = sphi %s2842_s18, %s3691_s18   ;;  %s2788_s17 = sphi %s2840_s17, %s3690_s17  }
  0x14   : > { %p29_p5 = scmp.ge.s32.totalorder %s28_s23, 3  ;;  %p49_p6 = scmp.ne.s32.totalorder %s2792_s18, %s2788_s17 }
  0x15   : > { %p50_p7 = scmp.eq.s32.totalorder %s2812_s22, 0  ;;  %s35_s25 = smul.u32 3, %s2808_s21 }
  0x16   : > { %s3697_s23 = smov (%p29_p5, %s28_s23), 0  ;;  %s3699_s24 = smov (!%p29_p5, %s31_s24), %s2808_s21 }
  0x17   : > { %p33_p8 = scmp.ge.s32.totalorder %s3699_s24, 2  ;;  %p2884_p9 = por %p50_p7, %p49_p6 }
  0x18   : > { %s2891_s27 = sadd.s32 %s2804_s20, %s35_s25  ;;  %s42_s4 = sadd.s32 1, %s2792_s18 }
  0x19   : > { %s3701_s24 = smov (%p33_p8, %s3699_s24), 0  ;;  %p2014_p11 = scmp.ge.s32.totalorder %s2812_s22, 6 }
  0x1a   : > { %s37_s28 = smul.u32 3, %s3701_s24 }
  0x1b   : > { %131 = sbr.rel (%p2014_p11) target bundleno = 79 (0x4f), region = 16 }
  0x1c   : > { %s38_s29 = sadd.s32 %s37_s28, %s3697_s23 }
  0x1d   : > { %s39_s30 = ssub.s32 %s2891_s27, %s38_s29 }
  0x1e   : > { %p40_p10 = scmp.eq.s32.totalorder %s39_s30, 0 }
  0x20   : > { %s2898_s5 = scalar_select %p40_p10, %s2792_s18, %s42_s4  }
  0x22   : > { %134 = sbr.rel (!%p2884_p9) target bundleno = 59 (0x3b), region = 20  ;;  %s136_s6 = sand.u32 (%p2884_p9), 1, %s2792_s18  }
  0x23   : > { %s2168_s7 = sshll.u32 (%p2884_p9), %s2891_s27, 3  ;;  %s2539_s8 = smul.u32 (%p2884_p9), 336, %s136_s6 }
  0x24   : > { %s2908_s11 = scalar_lea.vmem (%p2884_p9), %s3663_s1, %s2168_s7 }
  0x25   : > { %v159_v0 = vld [vmem:[%s2908_s11] sm:$0xff] (%p2884_p9)   ;;  %v163_v1 = vld [vmem:[%s2908_s11 + $0x30] sm:$0xff] (%p2884_p9)   ;;  %s2916_s12 = scalar_lea.vmem (%p2884_p9), [#allocation4], %s2539_s8 }
  0x26   : > { %v167_v2 = vld [vmem:[%s2908_s11 + $0x60] sm:$0xff] (%p2884_p9)   ;;  %v171_v3 = vld [vmem:[%s2908_s11 + $0x90] sm:$0xff] (%p2884_p9)   ;;  %160 = vst [vmem:[%s2916_s12] sm:$0xff] (%p2884_p9), %v159_v0   ;;  %164 = vst [vmem:[%s2916_s12 + $0x8] sm:$0xff] (%p2884_p9), %v163_v1  }
  0x27   : > { %v175_v4 = vld [vmem:[%s2908_s11 + $0xc0] sm:$0xff] (%p2884_p9)   ;;  %v179_v5 = vld [vmem:[%s2908_s11 + $0xf0] sm:$0xff] (%p2884_p9)   ;;  %168 = vst [vmem:[%s2916_s12 + $0x10] sm:$0xff] (%p2884_p9), %v167_v2   ;;  %172 = vst [vmem:[%s2916_s12 + $0x18] sm:$0xff] (%p2884_p9), %v171_v3  }
  0x28   : > { %176 = vst [vmem:[%s2916_s12 + $0x20] sm:$0xff] (%p2884_p9), %v175_v4   ;;  %180 = vst [vmem:[%s2916_s12 + $0x28] sm:$0xff] (%p2884_p9), %v179_v5   ;;  %v183_v6 = vld [vmem:[%s2908_s11 + $0x120] sm:$0xff] (%p2884_p9)   ;;  %v187_v7 = vld [vmem:[%s2908_s11 + $0x150] sm:$0xff] (%p2884_p9)  }
  0x29   : > { %v191_v8 = vld [vmem:[%s2908_s11 + $0x180] sm:$0xff]   ;;  %184 = vst [vmem:[%s2916_s12 + $0x30] sm:$0xff] %v183_v6   ;;  %188 = vst [vmem:[%s2916_s12 + $0x38] sm:$0xff] %v187_v7   ;;  %v195_v9 = vld [vmem:[%s2908_s11 + $0x1b0] sm:$0xff]  }
  0x2a   : > { %192 = vst [vmem:[%s2916_s12 + $0x40] sm:$0xff] %v191_v8   ;;  %v199_v10 = vld [vmem:[%s2908_s11 + $0x1e0] sm:$0xff]   ;;  %v203_v11 = vld [vmem:[%s2908_s11 + $0x210] sm:$0xff]   ;;  %196 = vst [vmem:[%s2916_s12 + $0x48] sm:$0xff] %v195_v9  }
  0x2b   : > { %200 = vst [vmem:[%s2916_s12 + $0x50] sm:$0xff] %v199_v10   ;;  %204 = vst [vmem:[%s2916_s12 + $0x58] sm:$0xff] %v203_v11   ;;  %v207_v12 = vld [vmem:[%s2908_s11 + $0x240] sm:$0xff]   ;;  %v211_v13 = vld [vmem:[%s2908_s11 + $0x270] sm:$0xff]  }
  0x2c   : > { %v215_v14 = vld [vmem:[%s2908_s11 + $0x2a0] sm:$0xff]   ;;  %208 = vst [vmem:[%s2916_s12 + $0x60] sm:$0xff] %v207_v12   ;;  %212 = vst [vmem:[%s2916_s12 + $0x68] sm:$0xff] %v211_v13   ;;  %v219_v15 = vld [vmem:[%s2908_s11 + $0x2d0] sm:$0xff]  }
  0x2d   : > { %216 = vst [vmem:[%s2916_s12 + $0x70] sm:$0xff] %v215_v14   ;;  %v223_v16 = vld [vmem:[%s2908_s11 + $0x300] sm:$0xff]   ;;  %v227_v17 = vld [vmem:[%s2908_s11 + $0x330] sm:$0xff]   ;;  %220 = vst [vmem:[%s2916_s12 + $0x78] sm:$0xff] %v219_v15  }
  0x2e   : > { %224 = vst [vmem:[%s2916_s12 + $0x80] sm:$0xff] %v223_v16   ;;  %228 = vst [vmem:[%s2916_s12 + $0x88] sm:$0xff] %v227_v17   ;;  %v231_v18 = vld [vmem:[%s2908_s11 + $0x360] sm:$0xff]   ;;  %v235_v19 = vld [vmem:[%s2908_s11 + $0x390] sm:$0xff]  }
  0x2f   : > { %v239_v20 = vld [vmem:[%s2908_s11 + $0x3c0] sm:$0xff]   ;;  %232 = vst [vmem:[%s2916_s12 + $0x90] sm:$0xff] %v231_v18   ;;  %236 = vst [vmem:[%s2916_s12 + $0x98] sm:$0xff] %v235_v19   ;;  %v243_v21 = vld [vmem:[%s2908_s11 + $0x3f0] sm:$0xff]  }
  0x30   : > { %240 = vst [vmem:[%s2916_s12 + $0xa0] sm:$0xff] %v239_v20   ;;  %v247_v22 = vld [vmem:[%s2908_s11 + $0x420] sm:$0xff]   ;;  %v251_v23 = vld [vmem:[%s2908_s11 + $0x450] sm:$0xff]   ;;  %244 = vst [vmem:[%s2916_s12 + $0xa8] sm:$0xff] %v243_v21  }
  0x31   : > { %248 = vst [vmem:[%s2916_s12 + $0xb0] sm:$0xff] %v247_v22   ;;  %252 = vst [vmem:[%s2916_s12 + $0xb8] sm:$0xff] %v251_v23   ;;  %v255_v24 = vld [vmem:[%s2908_s11 + $0x480] sm:$0xff]   ;;  %v259_v25 = vld [vmem:[%s2908_s11 + $0x4b0] sm:$0xff]  }
  0x32   : > { %v263_v26 = vld [vmem:[%s2908_s11 + $0x4e0] sm:$0xff]   ;;  %256 = vst [vmem:[%s2916_s12 + $0xc0] sm:$0xff] %v255_v24   ;;  %260 = vst [vmem:[%s2916_s12 + $0xc8] sm:$0xff] %v259_v25   ;;  %v267_v27 = vld [vmem:[%s2908_s11 + $0x510] sm:$0xff]  }
  0x33   : > { %264 = vst [vmem:[%s2916_s12 + $0xd0] sm:$0xff] %v263_v26   ;;  %v271_v28 = vld [vmem:[%s2908_s11 + $0x540] sm:$0xff]   ;;  %v275_v29 = vld [vmem:[%s2908_s11 + $0x570] sm:$0xff]   ;;  %268 = vst [vmem:[%s2916_s12 + $0xd8] sm:$0xff] %v267_v27  }
  0x34   : > { %272 = vst [vmem:[%s2916_s12 + $0xe0] sm:$0xff] %v271_v28   ;;  %276 = vst [vmem:[%s2916_s12 + $0xe8] sm:$0xff] %v275_v29   ;;  %v279_v30 = vld [vmem:[%s2908_s11 + $0x5a0] sm:$0xff]   ;;  %v283_v31 = vld [vmem:[%s2908_s11 + $0x5d0] sm:$0xff]  }
  0x35   : > { %v287_v32 = vld [vmem:[%s2908_s11 + $0x600] sm:$0xff]   ;;  %280 = vst [vmem:[%s2916_s12 + $0xf0] sm:$0xff] %v279_v30   ;;  %284 = vst [vmem:[%s2916_s12 + $0xf8] sm:$0xff] %v283_v31   ;;  %v291_v33 = vld [vmem:[%s2908_s11 + $0x630] sm:$0xff]  }
  0x36   : > { %288 = vst [vmem:[%s2916_s12 + $0x100] sm:$0xff] %v287_v32   ;;  %v295_v34 = vld [vmem:[%s2908_s11 + $0x660] sm:$0xff]   ;;  %v299_v35 = vld [vmem:[%s2908_s11 + $0x690] sm:$0xff]   ;;  %292 = vst [vmem:[%s2916_s12 + $0x108] sm:$0xff] %v291_v33  }
  0x37   : > { %296 = vst [vmem:[%s2916_s12 + $0x110] sm:$0xff] %v295_v34   ;;  %300 = vst [vmem:[%s2916_s12 + $0x118] sm:$0xff] %v299_v35   ;;  %v303_v36 = vld [vmem:[%s2908_s11 + $0x6c0] sm:$0xff]   ;;  %v307_v37 = vld [vmem:[%s2908_s11 + $0x6f0] sm:$0xff]  }
  0x38   : > { %v311_v38 = vld [vmem:[%s2908_s11 + $0x720] sm:$0xff]   ;;  %304 = vst [vmem:[%s2916_s12 + $0x120] sm:$0xff] %v303_v36   ;;  %308 = vst [vmem:[%s2916_s12 + $0x128] sm:$0xff] %v307_v37   ;;  %v315_v39 = vld [vmem:[%s2908_s11 + $0x750] sm:$0xff]  }
  0x39   : > { %312 = vst [vmem:[%s2916_s12 + $0x130] sm:$0xff] %v311_v38   ;;  %v319_v40 = vld [vmem:[%s2908_s11 + $0x780] sm:$0xff]   ;;  %v323_v41 = vld [vmem:[%s2908_s11 + $0x7b0] sm:$0xff]   ;;  %316 = vst [vmem:[%s2916_s12 + $0x138] sm:$0xff] %v315_v39  }
  0x3a   : > { %320 = vst [vmem:[%s2916_s12 + $0x140] sm:$0xff] %v319_v40   ;;  %324 = vst [vmem:[%s2916_s12 + $0x148] sm:$0xff] %v323_v41  }
  0x3b PF: > { %517 = sbr.rel (!%p2884_p9) target bundleno = 79 (0x4f), region = 61  ;;  %s519_s13 = sand.u32 (%p2884_p9), 1, %s2792_s18  }
  0x3c   : > { %s2169_s14 = sshll.u32 (%p2884_p9), %s2891_s27, 3  ;;  %s2017_s15 = sshll.u32 (%p2884_p9), %s519_s13, 8 }
  0x3d   : > { %s3003_s28 = scalar_lea.vmem (%p2884_p9), %s3664_s2, %s2169_s14  ;;  %s3008_s26 = scalar_lea.vmem (%p2884_p9), [#allocation5], %s2017_s15 }
  0x3e   : > { %v542_v42 = vld [vmem:[%s3003_s28] sm:$0xff] (%p2884_p9)   ;;  %v546_v43 = vld [vmem:[%s3003_s28 + $0x30] sm:$0xff] (%p2884_p9)  }
  0x3f   : > { %v550_v44 = vld [vmem:[%s3003_s28 + $0x60] sm:$0xff] (%p2884_p9)   ;;  %543 = vst [vmem:[%s3008_s26] sm:$0xff] (%p2884_p9), %v542_v42   ;;  %547 = vst [vmem:[%s3008_s26 + $0x8] sm:$0xff] (%p2884_p9), %v546_v43   ;;  %v554_v45 = vld [vmem:[%s3003_s28 + $0x90] sm:$0xff] (%p2884_p9)  }
  0x40   : > { %551 = vst [vmem:[%s3008_s26 + $0x10] sm:$0xff] (%p2884_p9), %v550_v44   ;;  %v558_v46 = vld [vmem:[%s3003_s28 + $0xc0] sm:$0xff] (%p2884_p9)   ;;  %v562_v47 = vld [vmem:[%s3003_s28 + $0xf0] sm:$0xff] (%p2884_p9)   ;;  %555 = vst [vmem:[%s3008_s26 + $0x18] sm:$0xff] (%p2884_p9), %v554_v45  }
  0x41   : > { %559 = vst [vmem:[%s3008_s26 + $0x20] sm:$0xff] (%p2884_p9), %v558_v46   ;;  %563 = vst [vmem:[%s3008_s26 + $0x28] sm:$0xff] (%p2884_p9), %v562_v47   ;;  %v566_v48 = vld [vmem:[%s3003_s28 + $0x120] sm:$0xff] (%p2884_p9)   ;;  %v570_v49 = vld [vmem:[%s3003_s28 + $0x150] sm:$0xff] (%p2884_p9)  }
  0x42   : > { %v574_v50 = vld [vmem:[%s3003_s28 + $0x180] sm:$0xff]   ;;  %567 = vst [vmem:[%s3008_s26 + $0x30] sm:$0xff] %v566_v48   ;;  %571 = vst [vmem:[%s3008_s26 + $0x38] sm:$0xff] %v570_v49   ;;  %v578_v51 = vld [vmem:[%s3003_s28 + $0x1b0] sm:$0xff]  }
  0x43   : > { %575 = vst [vmem:[%s3008_s26 + $0x40] sm:$0xff] %v574_v50   ;;  %v582_v52 = vld [vmem:[%s3003_s28 + $0x1e0] sm:$0xff]   ;;  %v586_v53 = vld [vmem:[%s3003_s28 + $0x210] sm:$0xff]   ;;  %579 = vst [vmem:[%s3008_s26 + $0x48] sm:$0xff] %v578_v51  }
  0x44   : > { %583 = vst [vmem:[%s3008_s26 + $0x50] sm:$0xff] %v582_v52   ;;  %587 = vst [vmem:[%s3008_s26 + $0x58] sm:$0xff] %v586_v53   ;;  %v590_v54 = vld [vmem:[%s3003_s28 + $0x240] sm:$0xff]   ;;  %v594_v55 = vld [vmem:[%s3003_s28 + $0x270] sm:$0xff]  }
  0x45   : > { %v598_v56 = vld [vmem:[%s3003_s28 + $0x2a0] sm:$0xff]   ;;  %591 = vst [vmem:[%s3008_s26 + $0x60] sm:$0xff] %v590_v54   ;;  %595 = vst [vmem:[%s3008_s26 + $0x68] sm:$0xff] %v594_v55   ;;  %v602_v57 = vld [vmem:[%s3003_s28 + $0x2d0] sm:$0xff]  }
  0x46   : > { %599 = vst [vmem:[%s3008_s26 + $0x70] sm:$0xff] %v598_v56   ;;  %v606_v58 = vld [vmem:[%s3003_s28 + $0x300] sm:$0xff]   ;;  %v610_v59 = vld [vmem:[%s3003_s28 + $0x330] sm:$0xff]   ;;  %603 = vst [vmem:[%s3008_s26 + $0x78] sm:$0xff] %v602_v57  }
  0x47   : > { %607 = vst [vmem:[%s3008_s26 + $0x80] sm:$0xff] %v606_v58   ;;  %611 = vst [vmem:[%s3008_s26 + $0x88] sm:$0xff] %v610_v59   ;;  %v614_v60 = vld [vmem:[%s3003_s28 + $0x360] sm:$0xff]   ;;  %v618_v61 = vld [vmem:[%s3003_s28 + $0x390] sm:$0xff]  }
  0x48   : > { %v622_v62 = vld [vmem:[%s3003_s28 + $0x3c0] sm:$0xff]   ;;  %615 = vst [vmem:[%s3008_s26 + $0x90] sm:$0xff] %v614_v60   ;;  %619 = vst [vmem:[%s3008_s26 + $0x98] sm:$0xff] %v618_v61   ;;  %v626_v63 = vld [vmem:[%s3003_s28 + $0x3f0] sm:$0xff]  }
  0x49   : > { %623 = vst [vmem:[%s3008_s26 + $0xa0] sm:$0xff] %v622_v62   ;;  %v630_v0 = vld [vmem:[%s3003_s28 + $0x420] sm:$0xff]   ;;  %v634_v1 = vld [vmem:[%s3003_s28 + $0x450] sm:$0xff]   ;;  %627 = vst [vmem:[%s3008_s26 + $0xa8] sm:$0xff] %v626_v63  }
  0x4a   : > { %631 = vst [vmem:[%s3008_s26 + $0xb0] sm:$0xff] %v630_v0   ;;  %635 = vst [vmem:[%s3008_s26 + $0xb8] sm:$0xff] %v634_v1   ;;  %v638_v2 = vld [vmem:[%s3003_s28 + $0x480] sm:$0xff]   ;;  %v642_v3 = vld [vmem:[%s3003_s28 + $0x4b0] sm:$0xff]  }
  0x4b   : > { %v646_v4 = vld [vmem:[%s3003_s28 + $0x4e0] sm:$0xff]   ;;  %639 = vst [vmem:[%s3008_s26 + $0xc0] sm:$0xff] %v638_v2   ;;  %643 = vst [vmem:[%s3008_s26 + $0xc8] sm:$0xff] %v642_v3   ;;  %v650_v5 = vld [vmem:[%s3003_s28 + $0x510] sm:$0xff]  }
  0x4c   : > { %647 = vst [vmem:[%s3008_s26 + $0xd0] sm:$0xff] %v646_v4   ;;  %v654_v6 = vld [vmem:[%s3003_s28 + $0x540] sm:$0xff]   ;;  %v658_v7 = vld [vmem:[%s3003_s28 + $0x570] sm:$0xff]   ;;  %651 = vst [vmem:[%s3008_s26 + $0xd8] sm:$0xff] %v650_v5  }
  0x4d   : > { %655 = vst [vmem:[%s3008_s26 + $0xe0] sm:$0xff] %v654_v6   ;;  %659 = vst [vmem:[%s3008_s26 + $0xe8] sm:$0xff] %v658_v7   ;;  %v662_v8 = vld [vmem:[%s3003_s28 + $0x5a0] sm:$0xff]   ;;  %v666_v9 = vld [vmem:[%s3003_s28 + $0x5d0] sm:$0xff]  }
  0x4e   : > { %663 = vst [vmem:[%s3008_s26 + $0xf0] sm:$0xff] %v662_v8   ;;  %667 = vst [vmem:[%s3008_s26 + $0xf8] sm:$0xff] %v666_v9  }
  0x4f PF: > { %p2020_p12 = scmp.ge.s32.totalorder %s2812_s22, 1  ;;  %p819_p13 = scmp.lt.s32.totalorder %s2812_s22, 7 }
  0x51   : > { %p820_p0 = pnand %p2020_p12, %p819_p13 }
  0x53   : > { %823 = sbr.rel (%p820_p0) target bundleno = 320 (0x140), region = 102 }
  0x5a   : > { %s826_s27 = sand.u32 1, %s2788_s17   ;;  %p864_p1 = scmp.lt.s32.totalorder %s2800_s0, 1 }
  0x5b   : > { %s2540_s29 = smul.u32 336, %s826_s27  ;;  %s2021_s30 = sshll.u32 %s826_s27, 8 }
  0x5c   : > { %s3703_s0 = smov (!%p864_p1, %s2800_s0), 1  ;;  %s3083_s10 = scalar_lea.vmem [#allocation5], %s2021_s30 }
  0x5d   : > { %s2170_s4 = sshll.u32 %s3703_s0, 6  ;;  %s3081_s9 = scalar_lea.vmem [#allocation4], %s2540_s29 }
  0x5e   : > { %s3079_s8 = scalar_lea.vmem %s3665_s3, %s2170_s4  ;;  %p2024_p2 = scmp.ne.s32.totalorder %s2796_s19, 0 }
  0x5f   : > { %v2815_v10 = vmov (!%p2024_p2), 0.0  }
  0x60   : > { %872 = sbr.rel (%p2024_p2) target bundleno = 103 (0x67), region = 114  ;;  %873 = vst [vmem:[%s3079_s8] sm:$0xff] (!%p2024_p2), %v2815_v10  ;;  %874 = vst [vmem:[%s3079_s8 + $0x8] sm:$0xff] (!%p2024_p2), %v2815_v10 }
  0x61   : > { %875 = vst [vmem:[%s3079_s8 + $0x10] sm:$0xff] (!%p2024_p2), %v2815_v10  ;;  %876 = vst [vmem:[%s3079_s8 + $0x18] sm:$0xff] (!%p2024_p2), %v2815_v10 }
  0x62   : > { %877 = vst [vmem:[%s3079_s8 + $0x20] sm:$0xff] (!%p2024_p2), %v2815_v10  ;;  %878 = vst [vmem:[%s3079_s8 + $0x28] sm:$0xff] (!%p2024_p2), %v2815_v10 }
  0x63   : > { %879 = vst [vmem:[%s3079_s8 + $0x30] sm:$0xff] (!%p2024_p2), %v2815_v10  ;;  %880 = vst [vmem:[%s3079_s8 + $0x38] sm:$0xff] (!%p2024_p2), %v2815_v10 }
  0x67 PF: > { %v2172_v11 = vld [vmem:[%s3081_s9] sm:$0xff]   ;;  %v2467_v12 = vld [vmem:[%s3081_s9 + $0x8] sm:$0xff]   ;;  %v2468_v13 = vld [vmem:[%s3081_s9 + $0x10] sm:$0xff]   ;;  %s3606_s17 = sld [smem:[#allocation3]]  ;;  %s3610_s19 = sld [smem:[#allocation3 + $0x1]] }
  0x68   : > { %v2173_v14 = vunpack.c.l.bf16 %v2172_v11  ;;  %v2174_v15 = vunpack.c.h.bf16 %v2172_v11  ;;  %v2177_v16 = vunpack.c.l.bf16 %v2467_v12  ;;  %v2178_v17 = vunpack.c.h.bf16 %v2467_v12  ;;  %v2469_v18 = vld [vmem:[%s3081_s9 + $0xa8] sm:$0xff]   ;;  %v2470_v19 = vld [vmem:[%s3081_s9 + $0xb0] sm:$0xff]   ;;  %v2471_v20 = vld [vmem:[%s3081_s9 + $0xb8] sm:$0xff]  }
  0x69   : > { %v2181_v21 = vunpack.c.l.bf16 %v2468_v13  ;;  %v2182_v22 = vunpack.c.h.bf16 %v2468_v13  ;;  %v2185_v23 = vunpack.c.l.bf16 %v2469_v18  ;;  %v2186_v24 = vunpack.c.h.bf16 %v2469_v18  ;;  %v2472_v45 = vld [vmem:[%s3081_s9 + $0x18] sm:$0xff]   ;;  %v2473_v46 = vld [vmem:[%s3081_s9 + $0x20] sm:$0xff]   ;;  %v2474_v51 = vld [vmem:[%s3081_s9 + $0x28] sm:$0xff]  }
  0x6a   : > { %v2189_v25 = vunpack.c.l.bf16 %v2470_v19  ;;  %v2190_v26 = vunpack.c.h.bf16 %v2470_v19  ;;  %v2193_v27 = vunpack.c.l.bf16 %v2471_v20  ;;  %v2194_v28 = vunpack.c.h.bf16 %v2471_v20  ;;  %v2475_v56 = vld [vmem:[%s3081_s9 + $0xc0] sm:$0xff]   ;;  %v2476_v57 = vld [vmem:[%s3081_s9 + $0xc8] sm:$0xff]   ;;  %v2477_v61 = vld [vmem:[%s3081_s9 + $0xd0] sm:$0xff]  }
  0x6b   : > { %v905_v29 = vmul.f32 5000.0, %v2173_v14  ;;  %v906_v30 = vmul.f32 5000.0, %v2174_v15  ;;  %v907_v31 = vmul.f32 5000.0, %v2177_v16  ;;  %v908_v32 = vmul.f32 5000.0, %v2178_v17 }
  0x6c   : > { %v909_v33 = vmul.f32 5000.0, %v2181_v21  ;;  %v910_v34 = vmul.f32 5000.0, %v2182_v22  ;;  %v911_v35 = vmul.f32 5000.0, %v2185_v23  ;;  %v912_v36 = vmul.f32 5000.0, %v2186_v24 }
  0x6d   : > { %v913_v37 = vmul.f32 5000.0, %v2189_v25  ;;  %v914_v38 = vmul.f32 5000.0, %v2190_v26  ;;  %v915_v39 = vmul.f32 5000.0, %v2193_v27  ;;  %v916_v40 = vmul.f32 5000.0, %v2194_v28  ;;  %v3107_v25 = vld [vmem:[%s3081_s9 + $0x30] sm:$0xff]   ;;  %s1873_s0 = scvt.s32.f32 %s3606_s17  ;;  %s1882_s11 = scvt.s32.f32 %s3610_s19 }
  0x6e   : > { %v917_v41 = vadd.f32 1.0, %v905_v29  ;;  %v918_v42 = vadd.f32 1.0, %v906_v30  ;;  %v919_v43 = vadd.f32 1.0, %v907_v31  ;;  %v920_v44 = vadd.f32 1.0, %v908_v32 }
  0x6f   : > { %v921_v47 = vadd.f32 1.0, %v909_v33  ;;  %v922_v48 = vadd.f32 1.0, %v910_v34  ;;  %v923_v49 = vadd.f32 1.0, %v911_v35  ;;  %v924_v50 = vadd.f32 1.0, %v912_v36  ;;  %v3110_v34 = vld [vmem:[%s3081_s9 + $0x38] sm:$0xff]  }
  0x70   : > { %v925_v52 = vadd.f32 1.0, %v913_v37  ;;  %v926_v53 = vadd.f32 1.0, %v914_v38  ;;  %v927_v54 = vadd.f32 1.0, %v915_v39  ;;  %v928_v55 = vadd.f32 1.0, %v916_v40 }
  0x71   : > { %2600 = vlog2.f32 %v917_v41  ;;  %v2197_v58 = vunpack.c.l.bf16 %v2472_v45  ;;  %v2198_v59 = vunpack.c.h.bf16 %v2472_v45  ;;  %v2201_v60 = vunpack.c.l.bf16 %v2473_v46 }
  0x72   : > { %2602 = vlog2.f32 %v918_v42  ;;  %v2202_v62 = vunpack.c.h.bf16 %v2473_v46  ;;  %v2205_v63 = vunpack.c.l.bf16 %v2474_v51  ;;  %v2206_v0 = vunpack.c.h.bf16 %v2474_v51 }
  0x73   : > { %2604 = vlog2.f32 %v919_v43  ;;  %v2209_v1 = vunpack.c.l.bf16 %v2475_v56  ;;  %v2210_v2 = vunpack.c.h.bf16 %v2475_v56  ;;  %v2213_v3 = vunpack.c.l.bf16 %v2476_v57  ;;  %v3117_v43 = vld [vmem:[%s3081_s9 + $0x40] sm:$0xff]  }
  0x74   : > { %2606 = vlog2.f32 %v920_v44  ;;  %v2214_v4 = vunpack.c.h.bf16 %v2476_v57  ;;  %v2217_v5 = vunpack.c.l.bf16 %v2477_v61  ;;  %v2218_v6 = vunpack.c.h.bf16 %v2477_v61  ;;  %v3135_v61 = vld [vmem:[%s3081_s9 + $0xe0] sm:$0xff]  }
  0x75   : > { %2608 = vlog2.f32 %v921_v47  ;;  %v990_v7 = vmul.f32 5000.0, %v2197_v58  ;;  %v991_v8 = vmul.f32 5000.0, %v2198_v59  ;;  %v992_v9 = vmul.f32 5000.0, %v2201_v60 }
  0x76   : > { %2610 = vlog2.f32 %v922_v48  ;;  %v993_v10 = vmul.f32 5000.0, %v2202_v62  ;;  %v994_v11 = vmul.f32 5000.0, %v2205_v63  ;;  %v995_v12 = vmul.f32 5000.0, %v2206_v0 }
  0x77   : > { %2612 = vlog2.f32 %v923_v49  ;;  %v996_v13 = vmul.f32 5000.0, %v2209_v1  ;;  %v997_v14 = vmul.f32 5000.0, %v2210_v2  ;;  %v998_v15 = vmul.f32 5000.0, %v2213_v3 }
  0x78   : > { %2614 = vlog2.f32 %v924_v50  ;;  %v999_v16 = vmul.f32 5000.0, %v2214_v4  ;;  %v1000_v17 = vmul.f32 5000.0, %v2217_v5  ;;  %v1001_v18 = vmul.f32 5000.0, %v2218_v6  ;;  %v3144_v6 = vld [vmem:[%s3081_s9 + $0xe8] sm:$0xff]  }
  0x79   : > { %2616 = vlog2.f32 %v925_v52  ;;  %v1002_v19 = vadd.f32 1.0, %v990_v7  ;;  %v1003_v20 = vadd.f32 1.0, %v991_v8  ;;  %v1004_v21 = vadd.f32 1.0, %v992_v9  ;;  %v3126_v52 = vld [vmem:[%s3081_s9 + $0xd8] sm:$0xff]  }
  0x7a   : > { %2618 = vlog2.f32 %v926_v53  ;;  %v1005_v22 = vadd.f32 1.0, %v993_v10  ;;  %v1006_v23 = vadd.f32 1.0, %v994_v11  ;;  %v1007_v24 = vadd.f32 1.0, %v995_v12 }
  0x7b   : > { %v2601_v26 = vpop.eup %2600  ;;  %2620 = vlog2.f32 %v927_v54  ;;  %v1008_v27 = vadd.f32 1.0, %v996_v13  ;;  %v1009_v28 = vadd.f32 1.0, %v997_v14  ;;  %v1010_v29 = vadd.f32 1.0, %v998_v15  ;;  %v3153_v15 = vld [vmem:[%s3081_s9 + $0x48] sm:$0xff]  }
  0x7c   : > { %v2603_v30 = vpop.eup %2602  ;;  %v930_v31 = vmul.f32 0.6931472, %v2601_v26  ;;  %2622 = vlog2.f32 %v928_v55  ;;  %v1011_v32 = vadd.f32 1.0, %v999_v16  ;;  %v1012_v33 = vadd.f32 1.0, %v1000_v17 }
  0x7d   : > { %v2605_v35 = vpop.eup %2604  ;;  %v932_v36 = vmul.f32 0.6931472, %v2603_v30  ;;  %v1013_v37 = vadd.f32 1.0, %v1001_v18  ;;  %2624 = vlog2.f32 %v1002_v19  ;;  %v2221_v38 = vunpack.c.l.bf16 %v3107_v25 }
  0x7e   : > { %v2607_v39 = vpop.eup %2606  ;;  %v934_v40 = vmul.f32 0.6931472, %v2605_v35  ;;  %v3113_v41 = vmul.f32 0.117406815, %v930_v31  ;;  %2626 = vlog2.f32 %v1003_v20  ;;  %v2222_v42 = vunpack.c.h.bf16 %v3107_v25 }
  0x7f   : > { %v2609_v44 = vpop.eup %2608  ;;  %v936_v45 = vmul.f32 0.6931472, %v2607_v39  ;;  %v3119_v46 = vmul.f32 0.117406815, %v932_v36  ;;  %2628 = vlog2.f32 %v1004_v21  ;;  %v2225_v47 = vunpack.c.l.bf16 %v3110_v34 }
  0x80   : > { %v2611_v48 = vpop.eup %2610  ;;  %v938_v49 = vmul.f32 0.6931472, %v2609_v44  ;;  %v3122_v50 = vmul.f32 0.117406815, %v934_v40  ;;  %2630 = vlog2.f32 %v1005_v22  ;;  %v2226_v51 = vunpack.c.h.bf16 %v3110_v34 }
  0x81   : > { %v2613_v53 = vpop.eup %2612  ;;  %v940_v54 = vmul.f32 0.6931472, %v2611_v48  ;;  %v3128_v55 = vmul.f32 0.117406815, %v936_v45  ;;  %2632 = vlog2.f32 %v1006_v23  ;;  %v2229_v56 = vunpack.c.l.bf16 %v3117_v43 }
  0x82   : > { %v2615_v57 = vpop.eup %2614  ;;  %v942_v58 = vmul.f32 0.6931472, %v2613_v53  ;;  %v3131_v59 = vmul.f32 0.117406815, %v938_v49  ;;  %2634 = vlog2.f32 %v1007_v24  ;;  %v2230_v60 = vunpack.c.h.bf16 %v3117_v43  ;;  %v3162_v24 = vld [vmem:[%s3081_s9 + $0x50] sm:$0xff]  }
  0x83   : > { %v2617_v62 = vpop.eup %2616  ;;  %v944_v63 = vmul.f32 0.6931472, %v2615_v57  ;;  %v3137_v0 = vmul.f32 0.117406815, %v940_v54  ;;  %2636 = vlog2.f32 %v1008_v27  ;;  %v2233_v1 = vunpack.c.l.bf16 %v3126_v52 }
  0x84   : > { %v2619_v2 = vpop.eup %2618  ;;  %v946_v3 = vmul.f32 0.6931472, %v2617_v62  ;;  %v3140_v4 = vmul.f32 0.117406815, %v942_v58  ;;  %2638 = vlog2.f32 %v1009_v28  ;;  %v2234_v5 = vunpack.c.h.bf16 %v3126_v52 }
  0x85   : > { %v2621_v7 = vpop.eup %2620  ;;  %v948_v8 = vmul.f32 0.6931472, %v2619_v2  ;;  %v3146_v9 = vmul.f32 0.117406815, %v944_v63  ;;  %2640 = vlog2.f32 %v1010_v29  ;;  %v2237_v10 = vunpack.c.l.bf16 %v3135_v61 }
  0x86   : > { %v2623_v11 = vpop.eup %2622  ;;  %v950_v12 = vmul.f32 0.6931472, %v2621_v7  ;;  %v3149_v13 = vmul.f32 0.117406815, %v946_v3  ;;  %2642 = vlog2.f32 %v1011_v32  ;;  %v2238_v14 = vunpack.c.h.bf16 %v3135_v61 }
  0x87   : > { %v2625_v16 = vpop.eup %2624  ;;  %v952_v17 = vmul.f32 0.6931472, %v2623_v11  ;;  %v3155_v18 = vmul.f32 0.117406815, %v948_v8  ;;  %2644 = vlog2.f32 %v1012_v33  ;;  %v2241_v19 = vunpack.c.l.bf16 %v3144_v6 }
  0x88   : > { %v2627_v20 = vpop.eup %2626  ;;  %v3158_v21 = vmul.f32 0.117406815, %v950_v12  ;;  %v1015_v22 = vmul.f32 0.6931472, %v2625_v16  ;;  %2646 = vlog2.f32 %v1013_v37  ;;  %v2242_v23 = vunpack.c.h.bf16 %v3144_v6 }
  0x89   : > { %v2629_v26 = vpop.eup %2628  ;;  %v3164_v27 = vmul.f32 0.117406815, %v952_v17  ;;  %v1017_v28 = vmul.f32 0.6931472, %v2627_v20  ;;  %v3168_v29 = vmul.f32 0.299, %v2221_v38  ;;  %v2245_v30 = vunpack.c.l.bf16 %v3153_v15 }
  0x8a   : > { %v2631_v31 = vpop.eup %2630  ;;  %v1019_v32 = vmul.f32 0.6931472, %v2629_v26  ;;  %v3171_v33 = vmul.f32 0.117406815, %v1015_v22  ;;  %v3175_v35 = vmul.f32 0.299, %v2222_v42  ;;  %v2246_v36 = vunpack.c.h.bf16 %v3153_v15 }
  0x8b   : > { %v2633_v37 = vpop.eup %2632  ;;  %v1021_v39 = vmul.f32 0.6931472, %v2631_v31  ;;  %v3178_v40 = vmul.f32 0.117406815, %v1017_v28  ;;  %v3180_v44 = vmul.f32 0.299, %v2233_v1  ;;  %v2249_v38 = vunpack.c.l.bf16 %v3162_v24 }
  0x8c   : > { %v2635_v45 = vpop.eup %2634  ;;  %v1023_v48 = vmul.f32 0.6931472, %v2633_v37  ;;  %v3183_v49 = vmul.f32 0.117406815, %v1019_v32  ;;  %v1050_v52 = vsub.f32 %v3113_v41, %v3171_v33  ;;  %v1112_v25 = vmul.f32 0.299, %v2234_v5 }
  0x8d   : > { %v2637_v42 = vpop.eup %2636  ;;  %v1025_v53 = vmul.f32 0.6931472, %v2635_v45  ;;  %v3187_v54 = vmul.f32 0.117406815, %v1021_v39  ;;  %v1051_v57 = vsub.f32 %v3119_v46, %v3178_v40  ;;  %v1113_v58 = vmul.f32 0.587, %v2225_v47 }
  0x8e   : > { %v2639_v62 = vpop.eup %2638  ;;  %v1027_v63 = vmul.f32 0.6931472, %v2637_v42  ;;  %v3193_v1 = vmul.f32 0.117406815, %v1023_v48  ;;  %v1052_v2 = vsub.f32 %v3122_v50, %v3183_v49  ;;  %v1062_v3 = vand.u32 2147483647, %v1050_v52 }
  0x8f   : > { %v2641_v41 = vpop.eup %2640  ;;  %v1029_v5 = vmul.f32 0.6931472, %v2639_v62  ;;  %v3197_v7 = vmul.f32 0.117406815, %v1025_v53  ;;  %v1053_v8 = vsub.f32 %v3128_v55, %v3187_v54  ;;  %v1063_v11 = vand.u32 2147483647, %v1051_v57 }
  0x90   : > { %v2643_v46 = vpop.eup %2642  ;;  %v1031_v12 = vmul.f32 0.6931472, %v2641_v41  ;;  %v3201_v16 = vmul.f32 0.117406815, %v1027_v63  ;;  %v1054_v47 = vsub.f32 %v3131_v59, %v3193_v1  ;;  %v1064_v17 = vand.u32 2147483647, %v1052_v2 }
  0x91   : > { %v2645_v20 = vpop.eup %2644  ;;  %v1033_v22 = vmul.f32 0.6931472, %v2643_v46  ;;  %v3205_v50 = vmul.f32 0.117406815, %v1029_v5  ;;  %v1055_v26 = vsub.f32 %v3137_v0, %v3197_v7  ;;  %v1065_v28 = vand.u32 2147483647, %v1053_v8 }
  0x92   : > { %v2647_v31 = vpop.eup %2646  ;;  %v1035_v32 = vmul.f32 0.6931472, %v2645_v20  ;;  %v3209_v55 = vmul.f32 0.117406815, %v1031_v12  ;;  %v1056_v37 = vsub.f32 %v3140_v4, %v3201_v16  ;;  %v1066_v39 = vand.u32 2147483647, %v1054_v47 }
  0x93   : > { %v1037_v45 = vmul.f32 0.6931472, %v2647_v31  ;;  %v3213_v48 = vmul.f32 0.117406815, %v1033_v22  ;;  %v1057_v59 = vsub.f32 %v3146_v9, %v3205_v50  ;;  %v1067_v52 = vand.u32 2147483647, %v1055_v26 }
  0x94   : > { %v3217_v42 = vmul.f32 0.117406815, %v1035_v32  ;;  %v1058_v0 = vsub.f32 %v3149_v13, %v3209_v55  ;;  %v1068_v53 = vand.u32 2147483647, %v1056_v37  ;;  %v1074_v57 = vadd.f32 %v1064_v17, %v1062_v3 }
  0x95   : > { %v3221_v62 = vmul.f32 0.117406815, %v1037_v45  ;;  %v1059_v4 = vsub.f32 %v3155_v18, %v3213_v48  ;;  %v1069_v63 = vand.u32 2147483647, %v1057_v59  ;;  %v1079_v2 = vadd.f32 %v1065_v28, %v1063_v11  ;;  %v2489_v45 = vld [vmem:[%s3081_s9 + $0x100] sm:$0xff]  }
  0x96   : > { %v1060_v41 = vsub.f32 %v3158_v21, %v3217_v42  ;;  %v1070_v9 = vand.u32 2147483647, %v1058_v0  ;;  %v1075_v5 = vadd.f32 %v1074_v57, %v1066_v39  ;;  %v1114_v8 = vmul.f32 0.587, %v2226_v51  ;;  %v2488_v39 = vld [vmem:[%s3081_s9 + $0xf8] sm:$0xff]  }
  0x97   : > { %v1061_v13 = vsub.f32 %v3164_v27, %v3221_v62  ;;  %v1071_v3 = vand.u32 2147483647, %v1059_v4  ;;  %v1080_v46 = vadd.f32 %v1079_v2, %v1067_v52  ;;  %v1115_v12 = vmul.f32 0.587, %v2237_v10  ;;  %v2486_v27 = vld [vmem:[%s3081_s9 + $0x58] sm:$0xff]  }
  0x98   : > { %v1072_v18 = vand.u32 2147483647, %v1060_v41  ;;  %v1076_v47 = vadd.f32 %v1075_v5, %v1068_v53  ;;  %v1116_v21 = vmul.f32 0.587, %v2238_v14  ;;  %v1117_v11 = vadd.f32 %v1113_v58, %v3168_v29  ;;  %v2487_v58 = vld [vmem:[%s3081_s9 + $0xf0] sm:$0xff]  }
  0x99   : > { %v1073_v17 = vand.u32 2147483647, %v1061_v13  ;;  %v1081_v20 = vadd.f32 %v1080_v46, %v1069_v63  ;;  %v1118_v34 = vadd.f32 %v1114_v8, %v3175_v35  ;;  %v1119_v51 = vadd.f32 %v1115_v12, %v3180_v44 }
  0x9a   : > { %v1077_v22 = vadd.f32 %v1076_v47, %v1070_v9  ;;  %v1120_v26 = vadd.f32 %v1116_v21, %v1112_v25  ;;  %v1121_v10 = vmul.f32 0.114, %v2229_v56  ;;  %v1122_v61 = vmul.f32 0.114, %v2230_v60 }
  0x9b   : > { %v1082_v14 = vadd.f32 %v1081_v20, %v1071_v3  ;;  %v1123_v29 = vmul.f32 0.114, %v2241_v19  ;;  %v1124_v35 = vmul.f32 0.114, %v2242_v23  ;;  %v2250_v44 = vunpack.c.h.bf16 %v3162_v24 }
  0x9c   : > { %v3249_v28 = vadd.f32 %v1077_v22, %v1072_v18  ;;  %v1125_v25 = vadd.f32 %v1121_v10, %v1117_v11  ;;  %v1126_v31 = vadd.f32 %v1122_v61, %v1118_v34  ;;  %v2253_v32 = vunpack.c.l.bf16 %v2486_v27  ;;  %v2490_v22 = vld [vmem:[%s3081_s9 + $0x60] sm:$0xff]  }
  0x9d   : > { %v3251_v56 = vadd.f32 %v1082_v14, %v1073_v17  ;;  %v1127_v43 = vadd.f32 %v1123_v29, %v1119_v51  ;;  %v1128_v37 = vadd.f32 %v1124_v35, %v1120_v26  ;;  %v2254_v60 = vunpack.c.h.bf16 %v2486_v27  ;;  %v2491_v26 = vld [vmem:[%s3081_s9 + $0x68] sm:$0xff]   ;;  %v2492_v35 = vld [vmem:[%s3081_s9 + $0x70] sm:$0xff]  }
  0x9e   : > { %3669 = vst [vmem:[#allocation7_spill] sm:$0xff] %v3249_v28  ;;  %vm1129_vm0 = vcmp.gt.f32.partialorder %v1125_v25, 0.8  ;;  %vm1130_vm1 = vcmp.gt.f32.partialorder %v1126_v31, 0.8  ;;  %v2257_v6 = vunpack.c.l.bf16 %v2487_v58  ;;  %v2258_v23 = vunpack.c.h.bf16 %v2487_v58 }
  0x9f   : > { %3670 = vst [vmem:[#allocation8_spill] sm:$0xff] %v3251_v56  ;;  %vm1133_vm2 = vcmp.lt.f32.partialorder %v1125_v25, 0.2  ;;  %vm1131_vm3 = vcmp.gt.f32.partialorder %v1127_v43, 0.8  ;;  %v2816_v52 = vmov 0.0   ;;  %v2261_v53 = vunpack.c.l.bf16 %v2488_v39 }
  0xa0   : > { %vm1132_vm4 = vcmp.gt.f32.partialorder %v1128_v37, 0.8  ;;  %vm1134_vm5 = vcmp.lt.f32.partialorder %v1126_v31, 0.2  ;;  %vm3255_vm6 = vmor %vm1129_vm0, %vm1133_vm2  ;;  %vm1135_vm7 = vcmp.lt.f32.partialorder %v1127_v43, 0.2  ;;  %v2262_v63 = vunpack.c.h.bf16 %v2488_v39 }
  0xa1   : > { %vm1136_vm8 = vcmp.lt.f32.partialorder %v1128_v37, 0.2  ;;  %vm3259_vm9 = vmor %vm1130_vm1, %vm1134_vm5  ;;  %v1141_v0 = vsel %vm3255_vm6, 1.0, %v2816_v52  ;;  %v2265_v2 = vunpack.c.l.bf16 %v2489_v45  ;;  %v2266_v41 = vunpack.c.h.bf16 %v2489_v45  ;;  %v2494_v43 = vld [vmem:[%s3081_s9 + $0x110] sm:$0xff]   ;;  %v2495_v45 = vld [vmem:[%s3081_s9 + $0x118] sm:$0xff]  }
  0xa2   : > { %vm3265_vm10 = vmor %vm1131_vm3, %vm1135_vm7  ;;  %v1142_v4 = vsel %vm3259_vm9, 1.0, %v2816_v52  ;;  %v3677_v9 = vmov 0  ;;  %v1172_v8 = vmul.f32 5000.0, %v2245_v30  ;;  %v1173_v13 = vmul.f32 5000.0, %v2246_v36 }
  0xa3   : > { %vm3272_vm11 = vmor %vm1132_vm4, %vm1136_vm8  ;;  %v1143_v5 = vsel %vm3265_vm10, 1.0, %v2816_v52  ;;  %v1174_v3 = vmul.f32 5000.0, %v2249_v38  ;;  %v1175_v18 = vmul.f32 5000.0, %v2250_v44  ;;  %v1176_v47 = vmul.f32 5000.0, %v2253_v32  ;;  %v2493_v32 = vld [vmem:[%s3081_s9 + $0x108] sm:$0xff]  }
  0xa4   : > { %v3678_v9 = vsel %vm3272_vm11, 4294967295, %v3677_v9  ;;  %v1144_v46 = vsel %vm3272_vm11, 1.0, %v2816_v52  ;;  %v3286_v12 = vadd.f32 %v1143_v5, %v1141_v0  ;;  %v1177_v11 = vmul.f32 5000.0, %v2254_v60 }
  0xa5   : > { %3679 = vst [vmem:[#allocation9_spill] sm:$0xff] %v3678_v9  ;;  %v3288_v21 = vadd.f32 %v1144_v46, %v1142_v4  ;;  %v1178_v17 = vmul.f32 5000.0, %v2257_v6  ;;  %v1179_v30 = vmul.f32 5000.0, %v2258_v23  ;;  %v1180_v15 = vmul.f32 5000.0, %v2261_v53 }
  0xa6   : > { %3680 = vst [vmem:[#allocation10_spill] sm:$0xff] %v3286_v12  ;;  %v1181_v36 = vmul.f32 5000.0, %v2262_v63  ;;  %v1182_v20 = vmul.f32 5000.0, %v2265_v2  ;;  %v1183_v24 = vmul.f32 5000.0, %v2266_v41  ;;  %v1184_v38 = vadd.f32 1.0, %v1172_v8 }
  0xa7   : > { %3681 = vst [vmem:[#allocation11_spill] sm:$0xff] %v3288_v21  ;;  %v1185_v34 = vadd.f32 1.0, %v1173_v13  ;;  %v1186_v51 = vadd.f32 1.0, %v1174_v3  ;;  %v1187_v27 = vadd.f32 1.0, %v1175_v18  ;;  %v1188_v10 = vadd.f32 1.0, %v1176_v47 }
  0xa8   : > { %v1189_v61 = vadd.f32 1.0, %v1177_v11  ;;  %v1190_v14 = vadd.f32 1.0, %v1178_v17  ;;  %v1191_v29 = vadd.f32 1.0, %v1179_v30  ;;  %v1192_v44 = vadd.f32 1.0, %v1180_v15 }
  0xa9   : > { %v1193_v58 = vadd.f32 1.0, %v1181_v36  ;;  %v1194_v25 = vadd.f32 1.0, %v1182_v20  ;;  %v1195_v31 = vadd.f32 1.0, %v1183_v24  ;;  %2648 = vlog2.f32 %v1184_v38 }
  0xaa   : > { %v2269_v37 = vunpack.c.l.bf16 %v2490_v22  ;;  %v2270_v60 = vunpack.c.h.bf16 %v2490_v22  ;;  %v2273_v39 = vunpack.c.l.bf16 %v2491_v26  ;;  %2650 = vlog2.f32 %v1185_v34  ;;  %v3299_v22 = vld [vmem:[%s3081_s9 + $0x78] sm:$0xff]  }
  0xab   : > { %v2274_v6 = vunpack.c.h.bf16 %v2491_v26  ;;  %v2277_v23 = vunpack.c.l.bf16 %v2492_v35  ;;  %v2278_v52 = vunpack.c.h.bf16 %v2492_v35  ;;  %2652 = vlog2.f32 %v1186_v51 }
  0xac   : > { %v2281_v0 = vunpack.c.l.bf16 %v2493_v32  ;;  %v2282_v53 = vunpack.c.h.bf16 %v2493_v32  ;;  %v2285_v4 = vunpack.c.l.bf16 %v2494_v43  ;;  %2654 = vlog2.f32 %v1187_v27  ;;  %v3312_v32 = vld [vmem:[%s3081_s9 + $0x80] sm:$0xff]  }
  0xad   : > { %v2286_v63 = vunpack.c.h.bf16 %v2494_v43  ;;  %v2289_v2 = vunpack.c.l.bf16 %v2495_v45  ;;  %v2290_v41 = vunpack.c.h.bf16 %v2495_v45  ;;  %2656 = vlog2.f32 %v1188_v10 }
  0xae   : > { %v1281_v5 = vmul.f32 5000.0, %v2269_v37  ;;  %v1282_v8 = vmul.f32 5000.0, %v2270_v60  ;;  %v1283_v13 = vmul.f32 5000.0, %v2273_v39  ;;  %2658 = vlog2.f32 %v1189_v61 }
  0xaf   : > { %v1284_v3 = vmul.f32 5000.0, %v2274_v6  ;;  %v1285_v46 = vmul.f32 5000.0, %v2277_v23  ;;  %v1286_v18 = vmul.f32 5000.0, %v2278_v52  ;;  %2660 = vlog2.f32 %v1190_v14 }
  0xb0   : > { %v1287_v47 = vmul.f32 5000.0, %v2281_v0  ;;  %v1288_v11 = vmul.f32 5000.0, %v2282_v53  ;;  %v1289_v17 = vmul.f32 5000.0, %v2285_v4  ;;  %2662 = vlog2.f32 %v1191_v29 }
  0xb1   : > { %v1290_v30 = vmul.f32 5000.0, %v2286_v63  ;;  %v1291_v15 = vmul.f32 5000.0, %v2289_v2  ;;  %v1292_v36 = vmul.f32 5000.0, %v2290_v41  ;;  %2664 = vlog2.f32 %v1192_v44 }
  0xb2   : > { %v1293_v20 = vadd.f32 1.0, %v1281_v5  ;;  %v1294_v24 = vadd.f32 1.0, %v1282_v8  ;;  %v1295_v38 = vadd.f32 1.0, %v1283_v13  ;;  %2666 = vlog2.f32 %v1193_v58 }
  0xb3   : > { %v1296_v34 = vadd.f32 1.0, %v1284_v3  ;;  %v1297_v51 = vadd.f32 1.0, %v1285_v46  ;;  %v3296_v27 = vadd.f32 1.0, %v1286_v18  ;;  %v2649_v26 = vpop.eup %2648  ;;  %2668 = vlog2.f32 %v1194_v25 }
  0xb4   : > { %v3301_v10 = vadd.f32 1.0, %v1287_v47  ;;  %v3303_v61 = vadd.f32 1.0, %v1288_v11  ;;  %v3305_v14 = vadd.f32 1.0, %v1289_v17  ;;  %v2651_v29 = vpop.eup %2650  ;;  %v1197_v35 = vmul.f32 0.6931472, %v2649_v26 }
  0xb5   : > { %2670 = vlog2.f32 %v1195_v31  ;;  %v3307_v44 = vadd.f32 1.0, %v1290_v30  ;;  %v3309_v58 = vadd.f32 1.0, %v1291_v15  ;;  %v2653_v43 = vpop.eup %2652  ;;  %v1199_v37 = vmul.f32 0.6931472, %v2651_v29 }
  0xb6   : > { %v3314_v60 = vadd.f32 1.0, %v1292_v36  ;;  %2672 = vlog2.f32 %v1293_v20  ;;  %v2293_v25 = vunpack.c.l.bf16 %v3299_v22  ;;  %v2655_v39 = vpop.eup %2654  ;;  %v1201_v45 = vmul.f32 0.6931472, %v2653_v43 }
  0xb7   : > { %v1220_v6 = vmul.f32 0.117406815, %v1197_v35  ;;  %2674 = vlog2.f32 %v1294_v24  ;;  %v2294_v23 = vunpack.c.h.bf16 %v3299_v22  ;;  %v2657_v31 = vpop.eup %2656  ;;  %v1203_v52 = vmul.f32 0.6931472, %v2655_v39 }
  0xb8   : > { %v1221_v0 = vmul.f32 0.117406815, %v1199_v37  ;;  %2676 = vlog2.f32 %v1295_v38  ;;  %v2297_v53 = vunpack.c.l.bf16 %v3312_v32  ;;  %v2659_v4 = vpop.eup %2658  ;;  %v1205_v63 = vmul.f32 0.6931472, %v2657_v31 }
  0xb9   : > { %v1222_v2 = vmul.f32 0.117406815, %v1201_v45  ;;  %v1232_v41 = vsub.f32 %v1220_v6, %v3171_v33  ;;  %2678 = vlog2.f32 %v1296_v34  ;;  %v2661_v5 = vpop.eup %2660  ;;  %v1207_v8 = vmul.f32 0.6931472, %v2659_v4 }
  0xba   : > { %v1223_v13 = vmul.f32 0.117406815, %v1203_v52  ;;  %v1233_v3 = vsub.f32 %v1221_v0, %v3178_v40  ;;  %2680 = vlog2.f32 %v1297_v51  ;;  %v2663_v46 = vpop.eup %2662  ;;  %v1209_v18 = vmul.f32 0.6931472, %v2661_v5 }
  0xbb   : > { %v1224_v47 = vmul.f32 0.117406815, %v1205_v63  ;;  %v1234_v11 = vsub.f32 %v1222_v2, %v3183_v49  ;;  %v3322_v17 = vand.u32 2147483647, %v1232_v41  ;;  %v2665_v30 = vpop.eup %2664  ;;  %v1211_v15 = vmul.f32 0.6931472, %v2663_v46 }
  0xbc   : > { %v1225_v36 = vmul.f32 0.117406815, %v1207_v8  ;;  %v1235_v20 = vsub.f32 %v1223_v13, %v3187_v54  ;;  %v3325_v24 = vand.u32 2147483647, %v1233_v3  ;;  %v2667_v38 = vpop.eup %2666  ;;  %v1213_v34 = vmul.f32 0.6931472, %v2665_v30 }
  0xbd   : > { %v1226_v26 = vmul.f32 0.117406815, %v1209_v18  ;;  %v1236_v29 = vsub.f32 %v1224_v47, %v3193_v1  ;;  %v3328_v51 = vand.u32 2147483647, %v1234_v11  ;;  %v2669_v35 = vpop.eup %2668  ;;  %v1215_v43 = vmul.f32 0.6931472, %v2667_v38 }
  0xbe   : > { %v1227_v37 = vmul.f32 0.117406815, %v1211_v15  ;;  %v1237_v39 = vsub.f32 %v1225_v36, %v3197_v7  ;;  %v3331_v45 = vand.u32 2147483647, %v1235_v20  ;;  %v1217_v31 = vmul.f32 0.6931472, %v2669_v35 }
  0xbf   : > { %v2671_v6 = vpop.eup %2670  ;;  %v1228_v52 = vmul.f32 0.117406815, %v1213_v34  ;;  %v1238_v0 = vsub.f32 %v1226_v26, %v3201_v16  ;;  %v3334_v4 = vand.u32 2147483647, %v1236_v29  ;;  %v1229_v41 = vmul.f32 0.117406815, %v1215_v43 }
  0xc0   : > { %v2673_v63 = vpop.eup %2672  ;;  %v1219_v2 = vmul.f32 0.6931472, %v2671_v6  ;;  %v1239_v5 = vsub.f32 %v1227_v37, %v3205_v50  ;;  %v3337_v8 = vand.u32 2147483647, %v1237_v39  ;;  %v1230_v3 = vmul.f32 0.117406815, %v1217_v31 }
  0xc1   : > { %v2675_v13 = vpop.eup %2674  ;;  %v1240_v46 = vsub.f32 %v1228_v52, %v3209_v55  ;;  %v3340_v18 = vand.u32 2147483647, %v1238_v0  ;;  %v1306_v47 = vmul.f32 0.6931472, %v2673_v63  ;;  %v1241_v15 = vsub.f32 %v1229_v41, %v3213_v48 }
  0xc2   : > { %v2677_v11 = vpop.eup %2676  ;;  %v1231_v30 = vmul.f32 0.117406815, %v1219_v2  ;;  %v3343_v36 = vand.u32 2147483647, %v1239_v5  ;;  %v1308_v20 = vmul.f32 0.6931472, %v2675_v13  ;;  %v1242_v34 = vsub.f32 %v1230_v3, %v3217_v42 }
  0xc3   : > { %v2679_v38 = vpop.eup %2678  ;;  %v3346_v26 = vand.u32 2147483647, %v1240_v46  ;;  %v1310_v29 = vmul.f32 0.6931472, %v2677_v11  ;;  %2682 = vlog2.f32 %v3296_v27  ;;  %v3350_v37 = vand.u32 2147483647, %v1241_v15 }
  0xc4   : > { %v2681_v35 = vpop.eup %2680  ;;  %v1243_v43 = vsub.f32 %v1231_v30, %v3221_v62  ;;  %v1312_v39 = vmul.f32 0.6931472, %v2679_v38  ;;  %2684 = vlog2.f32 %v3301_v10  ;;  %v3353_v6 = vand.u32 2147483647, %v1242_v34  ;;  %v2498_v5 = vld [vmem:[%s3081_s9 + $0x88] sm:$0xff]  }
  0xc5   : > { %v1314_v31 = vmul.f32 0.6931472, %v2681_v35  ;;  %2686 = vlog2.f32 %v3303_v61  ;;  %v1329_v52 = vmul.f32 0.117406815, %v1306_v47  ;;  %v1330_v27 = vmul.f32 0.117406815, %v1308_v20 }
  0xc6   : > { %v3356_v0 = vand.u32 2147483647, %v1243_v43  ;;  %2688 = vlog2.f32 %v3305_v14  ;;  %v1331_v63 = vmul.f32 0.117406815, %v1310_v29  ;;  %v1332_v2 = vmul.f32 0.117406815, %v1312_v39 }
  0xc7   : > { %2690 = vlog2.f32 %v3307_v44  ;;  %v1333_v41 = vmul.f32 0.117406815, %v1314_v31  ;;  %v1341_v10 = vsub.f32 %v1329_v52, %v3171_v33  ;;  %v1342_v61 = vsub.f32 %v1330_v27, %v3178_v40  ;;  %v2499_v14 = vld [vmem:[%s3081_s9 + $0x120] sm:$0xff]   ;;  %v2500_v11 = vld [vmem:[%s3081_s9 + $0x128] sm:$0xff]  }
  0xc8   : > { %2692 = vlog2.f32 %v3309_v58  ;;  %v1343_v13 = vsub.f32 %v1331_v63, %v3183_v49  ;;  %v2298_v3 = vunpack.c.h.bf16 %v3312_v32  ;;  %v1344_v46 = vsub.f32 %v1332_v2, %v3187_v54  ;;  %v2501_v58 = vld [vmem:[%s3081_s9 + $0x130] sm:$0xff]  }
  0xc9   : > { %2694 = vlog2.f32 %v3314_v60  ;;  %v1345_v44 = vsub.f32 %v1333_v41, %v3193_v1  ;;  %v1353_v47 = vand.u32 2147483647, %v1341_v10  ;;  %v1354_v30 = vand.u32 2147483647, %v1342_v61 }
  0xca   : > { %v1355_v15 = vand.u32 2147483647, %v1343_v13  ;;  %v2301_v20 = vunpack.c.l.bf16 %v2498_v5  ;;  %v2302_v38 = vunpack.c.h.bf16 %v2498_v5  ;;  %v1356_v34 = vand.u32 2147483647, %v1344_v46 }
  0xcb   : > { %v1357_v29 = vand.u32 2147483647, %v1345_v44  ;;  %v3373_v35 = vadd.f32 %v1353_v47, %v3322_v17  ;;  %v2305_v43 = vunpack.c.l.bf16 %v2499_v14  ;;  %v3376_v39 = vadd.f32 %v1354_v30, %v3325_v24 }
  0xcc   : > { %v3379_v60 = vadd.f32 %v1355_v15, %v3328_v51  ;;  %v2306_v31 = vunpack.c.h.bf16 %v2499_v14  ;;  %v2309_v52 = vunpack.c.l.bf16 %v2500_v11  ;;  %v3382_v63 = vadd.f32 %v1356_v34, %v3331_v45 }
  0xcd   : > { %v2683_v27 = vpop.eup %2682  ;;  %v3385_v2 = vadd.f32 %v1357_v29, %v3334_v4  ;;  %v2310_v41 = vunpack.c.h.bf16 %v2500_v11  ;;  %v2313_v10 = vunpack.c.l.bf16 %v2501_v58  ;;  %v2314_v61 = vunpack.c.h.bf16 %v2501_v58 }
  0xce   : > { %v2685_v17 = vpop.eup %2684  ;;  %v1316_v5 = vmul.f32 0.6931472, %v2683_v27  ;;  %v1402_v24 = vmul.f32 5000.0, %v2293_v25  ;;  %v1403_v51 = vmul.f32 5000.0, %v2294_v23  ;;  %v1404_v45 = vmul.f32 5000.0, %v2297_v53 }
  0xcf   : > { %v2687_v13 = vpop.eup %2686  ;;  %v1318_v14 = vmul.f32 0.6931472, %v2685_v17  ;;  %v1405_v46 = vmul.f32 5000.0, %v2298_v3  ;;  %v1406_v44 = vmul.f32 5000.0, %v2301_v20  ;;  %v1407_v30 = vmul.f32 5000.0, %v2302_v38 }
  0xd0   : > { %v2689_v4 = vpop.eup %2688  ;;  %v1320_v47 = vmul.f32 0.6931472, %v2687_v13  ;;  %v1334_v11 = vmul.f32 0.117406815, %v1316_v5  ;;  %v1408_v15 = vmul.f32 5000.0, %v2305_v43  ;;  %v1409_v27 = vmul.f32 5000.0, %v2306_v31 }
  0xd1   : > { %v2691_v34 = vpop.eup %2690  ;;  %v1322_v58 = vmul.f32 0.6931472, %v2689_v4  ;;  %v1335_v29 = vmul.f32 0.117406815, %v1318_v14  ;;  %v1410_v25 = vmul.f32 5000.0, %v2309_v52  ;;  %v1411_v12 = vmul.f32 5000.0, %v2310_v41 }
  0xd2   : > { %v2693_v21 = vpop.eup %2692  ;;  %v1324_v22 = vmul.f32 0.6931472, %v2691_v34  ;;  %v1336_v23 = vmul.f32 0.117406815, %v1320_v47  ;;  %v1346_v17 = vsub.f32 %v1334_v11, %v3197_v7  ;;  %v1412_v13 = vmul.f32 5000.0, %v2313_v10 }
  0xd3   : > { %v2695_v32 = vpop.eup %2694  ;;  %v1326_v53 = vmul.f32 0.6931472, %v2693_v21  ;;  %v1337_v3 = vmul.f32 0.117406815, %v1322_v58  ;;  %v1347_v20 = vsub.f32 %v1335_v29, %v3201_v16  ;;  %v1413_v34 = vmul.f32 5000.0, %v2314_v61 }
  0xd4   : > { %v1328_v5 = vmul.f32 0.6931472, %v2695_v32  ;;  %v1338_v38 = vmul.f32 0.117406815, %v1324_v22  ;;  %v1348_v43 = vsub.f32 %v1336_v23, %v3205_v50  ;;  %v1358_v4 = vand.u32 2147483647, %v1346_v17 }
  0xd5   : > { %v1339_v14 = vmul.f32 0.117406815, %v1326_v53  ;;  %v1349_v31 = vsub.f32 %v1337_v3, %v3209_v55  ;;  %v1359_v52 = vand.u32 2147483647, %v1347_v20  ;;  %v1414_v22 = vadd.f32 1.0, %v1402_v24 }
  0xd6   : > { %v1340_v47 = vmul.f32 0.117406815, %v1328_v5  ;;  %v1350_v11 = vsub.f32 %v1338_v38, %v3213_v48  ;;  %v1360_v41 = vand.u32 2147483647, %v1348_v43  ;;  %v3399_v21 = vadd.f32 %v1358_v4, %v3337_v8  ;;  %v2502_v43 = vld [vmem:[%s3081_s9 + $0x90] sm:$0xff]   ;;  %v2503_v4 = vld [vmem:[%s3081_s9 + $0x98] sm:$0xff]  }
  0xd7   : > { %v1351_v58 = vsub.f32 %v1339_v14, %v3217_v42  ;;  %v1361_v10 = vand.u32 2147483647, %v1349_v31  ;;  %v3403_v29 = vadd.f32 %v1359_v52, %v3340_v18  ;;  %v1415_v32 = vadd.f32 1.0, %v1403_v51  ;;  %v2504_v31 = vld [vmem:[%s3081_s9 + $0xa0] sm:$0xff]  }
  0xd8   : > { %v1352_v23 = vsub.f32 %v1340_v47, %v3221_v62  ;;  %v1362_v17 = vand.u32 2147483647, %v1350_v11  ;;  %v3407_v61 = vadd.f32 %v1360_v41, %v3343_v36  ;;  %v1416_v3 = vadd.f32 1.0, %v1404_v45  ;;  %v2506_v11 = vld [vmem:[%s3081_s9 + $0x140] sm:$0xff]  }
  0xd9   : > { %v1363_v53 = vand.u32 2147483647, %v1351_v58  ;;  %v3410_v8 = vadd.f32 %v1361_v10, %v3346_v26  ;;  %v1417_v20 = vadd.f32 1.0, %v1405_v46  ;;  %v1418_v24 = vadd.f32 1.0, %v1406_v44  ;;  %v2507_v58 = vld [vmem:[%s3081_s9 + $0x148] sm:$0xff]  }
  0xda   : > { %v1364_v5 = vand.u32 2147483647, %v1352_v23  ;;  %v3413_v18 = vadd.f32 %v1362_v17, %v3350_v37  ;;  %v1419_v38 = vadd.f32 1.0, %v1407_v30  ;;  %v1420_v51 = vadd.f32 1.0, %v1408_v15  ;;  %v2505_v37 = vld [vmem:[%s3081_s9 + $0x138] sm:$0xff]  }
  0xdb   : > { %v3418_v36 = vadd.f32 %v1363_v53, %v3353_v6  ;;  %v1421_v14 = vadd.f32 1.0, %v1409_v27  ;;  %v1422_v26 = vadd.f32 1.0, %v1410_v25  ;;  %v1423_v46 = vadd.f32 1.0, %v1411_v12 }
  0xdc   : > { %v3422_v45 = vadd.f32 %v1364_v5, %v3356_v0  ;;  %v1424_v52 = vadd.f32 1.0, %v1412_v13  ;;  %v1425_v47 = vadd.f32 1.0, %v1413_v34  ;;  %2696 = vlog2.f32 %v1414_v22 }
  0xdd   : > { %v2317_v44 = vunpack.c.l.bf16 %v2502_v43  ;;  %v2318_v30 = vunpack.c.h.bf16 %v2502_v43  ;;  %v2321_v41 = vunpack.c.l.bf16 %v2503_v4  ;;  %2698 = vlog2.f32 %v1415_v32 }
  0xde   : > { %v2322_v6 = vunpack.c.h.bf16 %v2503_v4  ;;  %v2325_v10 = vunpack.c.l.bf16 %v2504_v31  ;;  %v2326_v15 = vunpack.c.h.bf16 %v2504_v31  ;;  %2700 = vlog2.f32 %v1416_v3 }
  0xdf   : > { %v2329_v27 = vunpack.c.l.bf16 %v2505_v37  ;;  %v2330_v25 = vunpack.c.h.bf16 %v2505_v37  ;;  %v2333_v23 = vunpack.c.l.bf16 %v2506_v11  ;;  %2702 = vlog2.f32 %v1417_v20 }
  0xe0   : > { %v2334_v0 = vunpack.c.h.bf16 %v2506_v11  ;;  %v2337_v12 = vunpack.c.l.bf16 %v2507_v58  ;;  %v2338_v13 = vunpack.c.h.bf16 %v2507_v58  ;;  %2704 = vlog2.f32 %v1418_v24 }
  0xe1   : > { %v1523_v34 = vmul.f32 5000.0, %v2317_v44  ;;  %v1524_v17 = vmul.f32 5000.0, %v2318_v30  ;;  %v1525_v22 = vmul.f32 5000.0, %v2321_v41  ;;  %2706 = vlog2.f32 %v1419_v38  ;;  %v3430_v41 = vld [vmem:[%s3083_s10] sm:$0xff]  }
  0xe2   : > { %v1526_v53 = vmul.f32 5000.0, %v2322_v6  ;;  %v1527_v5 = vmul.f32 5000.0, %v2325_v10  ;;  %v1528_v43 = vmul.f32 5000.0, %v2326_v15  ;;  %2708 = vlog2.f32 %v1420_v51 }
  0xe3   : > { %v1529_v32 = vmul.f32 5000.0, %v2329_v27  ;;  %v1530_v4 = vmul.f32 5000.0, %v2330_v25  ;;  %v1531_v3 = vmul.f32 5000.0, %v2333_v23  ;;  %2710 = vlog2.f32 %v1421_v14  ;;  %v3443_v25 = vld [vmem:[%s3083_s10 + $0x8] sm:$0xff]  }
  0xe4   : > { %v1532_v31 = vmul.f32 5000.0, %v2334_v0  ;;  %v1533_v37 = vmul.f32 5000.0, %v2337_v12  ;;  %v1534_v20 = vmul.f32 5000.0, %v2338_v13  ;;  %2712 = vlog2.f32 %v1422_v26 }
  0xe5   : > { %v1535_v11 = vadd.f32 1.0, %v1523_v34  ;;  %v1536_v58 = vadd.f32 1.0, %v1524_v17  ;;  %v1537_v24 = vadd.f32 1.0, %v1525_v22  ;;  %2714 = vlog2.f32 %v1423_v46 }
  0xe6   : > { %v1538_v44 = vadd.f32 1.0, %v1526_v53  ;;  %v1539_v38 = vadd.f32 1.0, %v1527_v5  ;;  %v3427_v30 = vadd.f32 1.0, %v1528_v43  ;;  %v2697_v51 = vpop.eup %2696  ;;  %2716 = vlog2.f32 %v1424_v52 }
  0xe7   : > { %v3432_v6 = vadd.f32 1.0, %v1529_v32  ;;  %v3434_v14 = vadd.f32 1.0, %v1530_v4  ;;  %v3436_v10 = vadd.f32 1.0, %v1531_v3  ;;  %v2699_v26 = vpop.eup %2698  ;;  %v1427_v15 = vmul.f32 0.6931472, %v2697_v51 }
  0xe8   : > { %2718 = vlog2.f32 %v1425_v47  ;;  %v3438_v27 = vadd.f32 1.0, %v1532_v31  ;;  %v3440_v46 = vadd.f32 1.0, %v1533_v37  ;;  %v2701_v23 = vpop.eup %2700  ;;  %v1429_v0 = vmul.f32 0.6931472, %v2699_v26 }
  0xe9   : > { %v3445_v12 = vadd.f32 1.0, %v1534_v20  ;;  %2720 = vlog2.f32 %v1535_v11  ;;  %v2703_v13 = vpop.eup %2702  ;;  %v1431_v34 = vmul.f32 0.6931472, %v2701_v23  ;;  %v1450_v17 = vmul.f32 0.117406815, %v1427_v15 }
  0xea   : > { %2722 = vlog2.f32 %v1536_v58  ;;  %v2705_v47 = vpop.eup %2704  ;;  %v1433_v53 = vmul.f32 0.6931472, %v2703_v13  ;;  %v1451_v5 = vmul.f32 0.117406815, %v1429_v0 }
  0xeb   : > { %2724 = vlog2.f32 %v1537_v24  ;;  %v2707_v32 = vpop.eup %2706  ;;  %v1435_v4 = vmul.f32 0.6931472, %v2705_v47  ;;  %v1452_v3 = vmul.f32 0.117406815, %v1431_v34  ;;  %v1462_v31 = vsub.f32 %v1450_v17, %v3171_v33 }
  0xec   : > { %2726 = vlog2.f32 %v1538_v44  ;;  %v2709_v37 = vpop.eup %2708  ;;  %v1437_v20 = vmul.f32 0.6931472, %v2707_v32  ;;  %v1453_v11 = vmul.f32 0.117406815, %v1433_v53  ;;  %v1463_v51 = vsub.f32 %v1451_v5, %v3178_v40 }
  0xed   : > { %2728 = vlog2.f32 %v1539_v38  ;;  %v2711_v58 = vpop.eup %2710  ;;  %v1439_v26 = vmul.f32 0.6931472, %v2709_v37  ;;  %v1454_v15 = vmul.f32 0.117406815, %v1435_v4  ;;  %v1464_v23 = vsub.f32 %v1452_v3, %v3183_v49 }
  0xee   : > { %v1474_v24 = vand.u32 2147483647, %v1462_v31  ;;  %v2713_v0 = vpop.eup %2712  ;;  %v1441_v13 = vmul.f32 0.6931472, %v2711_v58  ;;  %v1455_v43 = vmul.f32 0.117406815, %v1437_v20  ;;  %v1465_v34 = vsub.f32 %v1453_v11, %v3187_v54 }
  0xef   : > { %v1475_v47 = vand.u32 2147483647, %v1463_v51  ;;  %v2715_v17 = vpop.eup %2714  ;;  %v1443_v44 = vmul.f32 0.6931472, %v2713_v0  ;;  %v1456_v22 = vmul.f32 0.117406815, %v1439_v26  ;;  %v1466_v53 = vsub.f32 %v1454_v15, %v3193_v1 }
  0xf0   : > { %v1476_v32 = vand.u32 2147483647, %v1464_v23  ;;  %v2717_v5 = vpop.eup %2716  ;;  %v1445_v38 = vmul.f32 0.6931472, %v2715_v17  ;;  %v1457_v52 = vmul.f32 0.117406815, %v1441_v13  ;;  %v1467_v4 = vsub.f32 %v1455_v43, %v3197_v7 }
  0xf1   : > { %v1477_v37 = vand.u32 2147483647, %v1465_v34  ;;  %v1447_v31 = vmul.f32 0.6931472, %v2717_v5  ;;  %v1458_v56 = vmul.f32 0.117406815, %v1443_v44  ;;  %v1468_v20 = vsub.f32 %v1456_v22, %v3201_v16 }
  0xf2   : > { %v2719_v3 = vpop.eup %2718  ;;  %v1478_v58 = vand.u32 2147483647, %v1466_v53  ;;  %v1459_v28 = vmul.f32 0.117406815, %v1445_v38  ;;  %v1469_v26 = vsub.f32 %v1457_v52, %v3205_v50  ;;  %v1479_v0 = vand.u32 2147483647, %v1467_v4 }
  0xf3   : > { %v2721_v11 = vpop.eup %2720  ;;  %v1449_v51 = vmul.f32 0.6931472, %v2719_v3  ;;  %v1460_v23 = vmul.f32 0.117406815, %v1447_v31  ;;  %v1470_v17 = vsub.f32 %v1458_v56, %v3209_v55  ;;  %v1480_v13 = vand.u32 2147483647, %v1468_v20 }
  0xf4   : > { %v2723_v15 = vpop.eup %2722  ;;  %v1486_v43 = vadd.f32 %v1474_v24, %v3373_v35  ;;  %v1471_v44 = vsub.f32 %v1459_v28, %v3213_v48  ;;  %v1481_v5 = vand.u32 2147483647, %v1469_v26  ;;  %v1487_v22 = vadd.f32 %v1475_v47, %v3376_v39  ;;  %v3490_v26 = vld [vmem:[%s3083_s10 + $0x80] sm:$0xff]  }
  0xf5   : > { %v2725_v34 = vpop.eup %2724  ;;  %v1461_v9 = vmul.f32 0.117406815, %v1449_v51  ;;  %v1472_v38 = vsub.f32 %v1460_v23, %v3217_v42  ;;  %v1482_v3 = vand.u32 2147483647, %v1470_v17  ;;  %v1488_v52 = vadd.f32 %v1476_v32, %v3379_v60 }
  0xf6   : > { %v2727_v53 = vpop.eup %2726  ;;  %v1489_v4 = vadd.f32 %v1477_v37, %v3382_v63  ;;  %v1483_v20 = vand.u32 2147483647, %v1471_v44  ;;  %v1490_v35 = vadd.f32 %v1478_v58, %v3385_v2  ;;  %v3468_v24 = vadd.f32 %v1479_v0, %v3399_v21 }
  0xf7   : > { %v2729_v31 = vpop.eup %2728  ;;  %v1473_v56 = vsub.f32 %v1461_v9, %v3221_v62  ;;  %v1484_v28 = vand.u32 2147483647, %v1472_v38  ;;  %v3471_v39 = vadd.f32 %v1480_v13, %v3403_v29  ;;  %v3474_v47 = vadd.f32 %v1481_v5, %v3407_v61 }
  0xf8   : > { %v3477_v60 = vadd.f32 %v1482_v3, %v3410_v8  ;;  %v3480_v9 = vadd.f32 %v1483_v20, %v3413_v18  ;;  %v1548_v32 = vmul.f32 0.6931472, %v2721_v11  ;;  %v1550_v2 = vmul.f32 0.6931472, %v2723_v15  ;;  %v2512_v3 = vld [vmem:[%s3083_s10 + $0x48] sm:$0xff]  }
  0xf9   : > { %v1485_v63 = vand.u32 2147483647, %v1473_v56  ;;  %v3483_v21 = vadd.f32 %v1484_v28, %v3418_v36  ;;  %v1552_v37 = vmul.f32 0.6931472, %v2725_v34  ;;  %v1554_v58 = vmul.f32 0.6931472, %v2727_v53 }
  0xfa   : > { %v1556_v51 = vmul.f32 0.6931472, %v2729_v31  ;;  %2730 = vlog2.f32 %v3427_v30  ;;  %v1571_v61 = vmul.f32 0.117406815, %v1548_v32  ;;  %v1572_v8 = vmul.f32 0.117406815, %v1550_v2 }
  0xfb   : > { %v3486_v29 = vadd.f32 %v1485_v63, %v3422_v45  ;;  %2732 = vlog2.f32 %v3432_v6  ;;  %v1573_v18 = vmul.f32 0.117406815, %v1552_v37  ;;  %v1574_v11 = vmul.f32 0.117406815, %v1554_v58 }
  0xfc   : > { %v1575_v36 = vmul.f32 0.117406815, %v1556_v51  ;;  %2734 = vlog2.f32 %v3434_v14  ;;  %v1583_v0 = vsub.f32 %v1571_v61, %v3171_v33  ;;  %v1584_v45 = vsub.f32 %v1572_v8, %v3178_v40  ;;  %v3504_v33 = vld [vmem:[%s3083_s10 + $0x88] sm:$0xff]   ;;  %v2511_v40 = vld [vmem:[%s3083_s10 + $0x40] sm:$0xff]  }
  0xfd   : > { %v2346_v15 = vunpack.c.h.bf16 %v3443_v25  ;;  %2736 = vlog2.f32 %v3436_v10  ;;  %v1585_v30 = vsub.f32 %v1573_v18, %v3183_v49  ;;  %v1586_v23 = vsub.f32 %v1574_v11, %v3187_v54 }
  0xfe   : > { %v1587_v6 = vsub.f32 %v1575_v36, %v3193_v1  ;;  %2738 = vlog2.f32 %v3438_v27  ;;  %v1595_v17 = vand.u32 2147483647, %v1583_v0  ;;  %v1596_v13 = vand.u32 2147483647, %v1584_v45 }
  0xff   : > { %v2349_v14 = vunpack.c.l.bf16 %v3490_v26  ;;  %2740 = vlog2.f32 %v3440_v46  ;;  %v1597_v34 = vand.u32 2147483647, %v1585_v30  ;;  %v1598_v10 = vand.u32 2147483647, %v1586_v23 }
 0x100   : > { %v1599_v49 = vand.u32 2147483647, %v1587_v6  ;;  %2742 = vlog2.f32 %v3445_v12  ;;  %v1607_v54 = vadd.f32 %v1595_v17, %v1486_v43  ;;  %v1608_v1 = vadd.f32 %v1596_v13, %v1487_v22  ;;  %v2513_v12 = vld [vmem:[%s3083_s10 + $0xc0] sm:$0xff]   ;;  %v2514_v43 = vld [vmem:[%s3083_s10 + $0xc8] sm:$0xff]  }
 0x101   : > { %v2350_v27 = vunpack.c.h.bf16 %v3490_v26  ;;  %v1609_v44 = vadd.f32 %v1597_v34, %v1488_v52  ;;  %v1610_v5 = vadd.f32 %v1598_v10, %v1489_v4  ;;  %v2353_v38 = vunpack.c.l.bf16 %v3504_v33 }
 0x102   : > { %v1611_v53 = vadd.f32 %v1599_v49, %v1490_v35  ;;  %v1627_v46 = vsel %vm3255_vm6, %v1607_v54, 0.0  ;;  %v1628_v31 = vsel %vm3259_vm9, %v1608_v1, 0.0  ;;  %v2354_v56 = vunpack.c.h.bf16 %v3504_v33 }
 0x103   : > { %v2357_v20 = vunpack.c.l.bf16 %v2511_v40  ;;  %v1629_v22 = vsel %vm3255_vm6, %v1609_v44, 0.0  ;;  %v1630_v52 = vsel %vm3259_vm9, %v1610_v5, 0.0  ;;  %v2358_v35 = vunpack.c.h.bf16 %v2511_v40 }
 0x104   : > { %v1631_v4 = vsel %vm3255_vm6, %v1611_v53, 0.0  ;;  %v2731_v28 = vpop.eup %2730  ;;  %v1639_v63 = vadd.f32 %v1629_v22, %v1627_v46  ;;  %v1644_v32 = vadd.f32 %v1630_v52, %v1628_v31  ;;  %v2361_v2 = vunpack.c.l.bf16 %v2512_v3 }
 0x105   : > { %v2362_v37 = vunpack.c.h.bf16 %v2512_v3  ;;  %v2733_v58 = vpop.eup %2732  ;;  %v1558_v51 = vmul.f32 0.6931472, %v2731_v28  ;;  %v2365_v61 = vunpack.c.l.bf16 %v2513_v12  ;;  %v2366_v8 = vunpack.c.h.bf16 %v2513_v12 }
 0x106   : > { %v2369_v26 = vunpack.c.l.bf16 %v2514_v43  ;;  %v2735_v18 = vpop.eup %2734  ;;  %v1560_v11 = vmul.f32 0.6931472, %v2733_v58  ;;  %v1640_v36 = vadd.f32 %v1639_v63, %v1631_v4  ;;  %v2370_v0 = vunpack.c.h.bf16 %v2514_v43 }
 0x107   : > { %v3682_v45 = vunpack.c.l.bf16 %v3430_v41  ;;  %v2737_v19 = vpop.eup %2736  ;;  %v1562_v23 = vmul.f32 0.6931472, %v2735_v18  ;;  %v1576_v6 = vmul.f32 0.117406815, %v1558_v51  ;;  %v3683_v17 = vunpack.c.h.bf16 %v3430_v41 }
 0x108   : > { %v3684_v33 = vunpack.c.l.bf16 %v3443_v25  ;;  %v2739_v34 = vpop.eup %2738  ;;  %v1564_v10 = vmul.f32 0.6931472, %v2737_v19  ;;  %v1577_v49 = vmul.f32 0.117406815, %v1560_v11  ;;  %v3537_v54 = vsub.f32 %v2346_v15, %v2362_v37  ;;  %v2515_v19 = vld [vmem:[%s3083_s10 + $0x10] sm:$0xff]  }
 0x109   : > { %v3527_v30 = vsub.f32 %v3682_v45, %v2357_v20  ;;  %v3531_v13 = vsub.f32 %v3683_v17, %v2358_v35  ;;  %v3539_v1 = vsub.f32 %v2349_v14, %v2365_v61  ;;  %v2741_v44 = vpop.eup %2740  ;;  %v1566_v5 = vmul.f32 0.6931472, %v2739_v34 }
 0x10a   : > { %v3535_v40 = vsub.f32 %v3684_v33, %v2361_v2  ;;  %v1578_v53 = vmul.f32 0.117406815, %v1562_v23  ;;  %v1588_v3 = vsub.f32 %v1576_v6, %v3197_v7  ;;  %v3542_v46 = vsub.f32 %v2350_v27, %v2366_v8  ;;  %v2743_v41 = vpop.eup %2742  ;;  %v2517_v23 = vld [vmem:[%s3083_s10 + $0x90] sm:$0xff]  }
 0x10b   : > { %v1568_v31 = vmul.f32 0.6931472, %v2741_v44  ;;  %v1579_v20 = vmul.f32 0.117406815, %v1564_v10  ;;  %v1589_v25 = vsub.f32 %v1577_v49, %v3201_v16  ;;  %v3545_v12 = vsub.f32 %v2353_v38, %v2369_v26  ;;  %v2519_v49 = vld [vmem:[%s3083_s10 + $0x50] sm:$0xff]  }
 0x10c   : > { %v1570_v43 = vmul.f32 0.6931472, %v2743_v41  ;;  %v1580_v22 = vmul.f32 0.117406815, %v1566_v5  ;;  %v1590_v15 = vsub.f32 %v1578_v53, %v3205_v50  ;;  %v1600_v14 = vand.u32 2147483647, %v1588_v3 }
 0x10d   : > { %v1581_v52 = vmul.f32 0.117406815, %v1568_v31  ;;  %v1591_v4 = vsub.f32 %v1579_v20, %v3209_v55  ;;  %v1601_v35 = vand.u32 2147483647, %v1589_v25  ;;  %v3549_v28 = vsub.f32 %v2354_v56, %v2370_v0  ;;  %v2520_v53 = vld [vmem:[%s3083_s10 + $0x58] sm:$0xff]  }
 0x10e   : > { %v1582_v7 = vmul.f32 0.117406815, %v1570_v43  ;;  %v1592_v27 = vsub.f32 %v1580_v22, %v3213_v48  ;;  %v1602_v63 = vand.u32 2147483647, %v1590_v15  ;;  %v1612_v2 = vadd.f32 %v1600_v14, %v3468_v24  ;;  %v2522_v25 = vld [vmem:[%s3083_s10 + $0xd8] sm:$0xff]  }
 0x10f   : > { %v1593_v16 = vsub.f32 %v1581_v52, %v3217_v42  ;;  %v1603_v38 = vand.u32 2147483647, %v1591_v4  ;;  %v1613_v37 = vadd.f32 %v1601_v35, %v3471_v39  ;;  %v1690_v50 = vand.u32 2147483647, %v3527_v30  ;;  %v2530_v30 = vld [vmem:[%s3083_s10 + $0xe8] sm:$0xff]  }
 0x110   : > { %v1594_v58 = vsub.f32 %v1582_v7, %v3221_v62  ;;  %v1604_v51 = vand.u32 2147483647, %v1592_v27  ;;  %v1614_v55 = vadd.f32 %v1602_v63, %v3474_v47  ;;  %v1632_v56 = vsel %vm3259_vm9, %v1612_v2, 0.0  ;;  %v2523_v63 = vld [vmem:[%s3083_s10 + $0x20] sm:$0xff]  }
 0x111   : > { %v1605_v61 = vand.u32 2147483647, %v1593_v16  ;;  %v1615_v48 = vadd.f32 %v1603_v38, %v3477_v60  ;;  %v1633_v42 = vsel %vm3265_vm10, %v1613_v37, 0.0  ;;  %v1645_v24 = vadd.f32 %v1644_v32, %v1632_v56 }
 0x112   : > { %v1606_v39 = vand.u32 2147483647, %v1594_v58  ;;  %v1616_v8 = vadd.f32 %v1604_v51, %v3480_v9  ;;  %v1634_v26 = vsel %vm3272_vm11, %v1614_v55, 0.0  ;;  %v1641_v47 = vadd.f32 %v1640_v36, %v1633_v42  ;;  %v2516_v36 = vld [vmem:[%s3083_s10 + $0x18] sm:$0xff]  }
 0x113   : > { %v1617_v59 = vadd.f32 %v1605_v61, %v3483_v21  ;;  %v1635_v18 = vsel %vm3265_vm10, %v1615_v48, 0.0  ;;  %v1646_v60 = vadd.f32 %v1645_v24, %v1634_v26  ;;  %v1691_v11 = vand.u32 2147483647, %v3531_v13  ;;  %v2518_v13 = vld [vmem:[%s3083_s10 + $0x98] sm:$0xff]   ;;  %v2524_v61 = vld [vmem:[%s3083_s10 + $0x28] sm:$0xff]   ;;  %v2525_v48 = vld [vmem:[%s3083_s10 + $0xa0] sm:$0xff]  }
 0x114   : > { %v1618_v0 = vadd.f32 %v1606_v39, %v3486_v29  ;;  %v1636_v32 = vsel %vm3272_vm11, %v1616_v8, 0.0  ;;  %v1642_v9 = vadd.f32 %v1641_v47, %v1635_v18  ;;  %v1692_v45 = vand.u32 2147483647, %v3535_v40 }
 0x115   : > { %v1637_v21 = vsel %vm3265_vm10, %v1617_v59, 0.0  ;;  %v1647_v6 = vadd.f32 %v1646_v60, %v1636_v32  ;;  %v1693_v17 = vand.u32 2147483647, %v3537_v54  ;;  %v1694_v29 = vand.u32 2147483647, %v3539_v1  ;;  %v2521_v1 = vld [vmem:[%s3083_s10 + $0xd0] sm:$0xff]  }
 0x116   : > { %v1638_v33 = vsel %vm3272_vm11, %v1618_v0, 0.0  ;;  %v3584_v34 = vadd.f32 %v1642_v9, %v1637_v21  ;;  %v1695_v40 = vand.u32 2147483647, %v3542_v46  ;;  %v1696_v10 = vand.u32 2147483647, %v3545_v12  ;;  %v2526_v9 = vld [vmem:[%s3083_s10 + $0xa8] sm:$0xff]  }
 0x117   : > { %v3589_v57 = vadd.f32 %v1647_v6, %v1638_v33  ;;  %v1697_v44 = vand.u32 2147483647, %v3549_v28  ;;  %v2373_v5 = vunpack.c.l.bf16 %v2515_v19  ;;  %v2374_v54 = vunpack.c.h.bf16 %v2515_v19  ;;  %v2527_v19 = vld [vmem:[%s3083_s10 + $0x60] sm:$0xff]  }
 0x118   : > { %v2377_v3 = vunpack.c.l.bf16 %v2516_v36  ;;  %v2378_v41 = vunpack.c.h.bf16 %v2516_v36  ;;  %v2381_v31 = vunpack.c.l.bf16 %v2517_v23  ;;  %v2382_v20 = vunpack.c.h.bf16 %v2517_v23  ;;  %v2529_v33 = vld [vmem:[%s3083_s10 + $0xe0] sm:$0xff]  }
 0x119   : > { %v2385_v43 = vunpack.c.l.bf16 %v2518_v13  ;;  %v2386_v22 = vunpack.c.h.bf16 %v2518_v13  ;;  %v2389_v46 = vunpack.c.l.bf16 %v2519_v49  ;;  %v2390_v15 = vunpack.c.h.bf16 %v2519_v49  ;;  %v2528_v13 = vld [vmem:[%s3083_s10 + $0x68] sm:$0xff]  }
 0x11a   : > { %v2393_v12 = vunpack.c.l.bf16 %v2520_v53  ;;  %v2394_v14 = vunpack.c.h.bf16 %v2520_v53  ;;  %v2397_v52 = vunpack.c.l.bf16 %v2521_v1  ;;  %v2398_v4 = vunpack.c.h.bf16 %v2521_v1 }
 0x11b   : > { %v2401_v35 = vunpack.c.l.bf16 %v2522_v25  ;;  %v2402_v28 = vunpack.c.h.bf16 %v2522_v25  ;;  %v1732_v7 = vsub.f32 %v2373_v5, %v2389_v46  ;;  %v1733_v27 = vsub.f32 %v2374_v54, %v2390_v15 }
 0x11c   : > { %v1734_v2 = vsub.f32 %v2377_v3, %v2393_v12  ;;  %v1735_v16 = vsub.f32 %v2378_v41, %v2394_v14  ;;  %v1736_v38 = vsub.f32 %v2381_v31, %v2397_v52  ;;  %v1737_v37 = vsub.f32 %v2382_v20, %v2398_v4  ;;  %v2531_v20 = vld [vmem:[%s3083_s10 + $0x30] sm:$0xff]   ;;  %v2532_v4 = vld [vmem:[%s3083_s10 + $0x38] sm:$0xff]  }
 0x11d   : > { %v1738_v58 = vsub.f32 %v2385_v43, %v2401_v35  ;;  %v1739_v51 = vsub.f32 %v2386_v22, %v2402_v28  ;;  %v1740_v55 = vand.u32 2147483647, %v1732_v7  ;;  %v1741_v56 = vand.u32 2147483647, %v1733_v27  ;;  %v2533_v35 = vld [vmem:[%s3083_s10 + $0xb0] sm:$0xff]  }
 0x11e   : > { %v1742_v42 = vand.u32 2147483647, %v1734_v2  ;;  %v1743_v24 = vand.u32 2147483647, %v1735_v16  ;;  %v1744_v39 = vand.u32 2147483647, %v1736_v38  ;;  %v2405_v8 = vunpack.c.l.bf16 %v2523_v63 }
 0x11f   : > { %v1745_v62 = vand.u32 2147483647, %v1737_v37  ;;  %v1746_v26 = vand.u32 2147483647, %v1738_v58  ;;  %v1747_v47 = vand.u32 2147483647, %v1739_v51  ;;  %v1748_v59 = vadd.f32 %v1740_v55, %v1690_v50 }
 0x120   : > { %v1749_v18 = vadd.f32 %v1741_v56, %v1691_v11  ;;  %v1750_v60 = vadd.f32 %v1742_v42, %v1692_v45  ;;  %v1751_v0 = vadd.f32 %v1743_v24, %v1693_v17  ;;  %v1752_v32 = vadd.f32 %v1744_v39, %v1694_v29 }
 0x121   : > { %v1753_v36 = vadd.f32 %v1745_v62, %v1695_v40  ;;  %v1754_v23 = vadd.f32 %v1746_v26, %v1696_v10  ;;  %v1755_v21 = vadd.f32 %v1747_v47, %v1697_v44  ;;  %v2406_v6 = vunpack.c.h.bf16 %v2523_v63  ;;  %v2536_v62 = vld [vmem:[%s3083_s10 + $0x78] sm:$0xff]   ;;  %v2537_v26 = vld [vmem:[%s3083_s10 + $0xf0] sm:$0xff]  }
 0x122   : > { %v2409_v49 = vunpack.c.l.bf16 %v2524_v61  ;;  %v2410_v5 = vunpack.c.h.bf16 %v2524_v61  ;;  %v2413_v54 = vunpack.c.l.bf16 %v2525_v48  ;;  %v2414_v53 = vunpack.c.h.bf16 %v2525_v48  ;;  %v2534_v61 = vld [vmem:[%s3083_s10 + $0xb8] sm:$0xff]   ;;  %v2535_v48 = vld [vmem:[%s3083_s10 + $0x70] sm:$0xff]  }
 0x123   : > { %v2417_v50 = vunpack.c.l.bf16 %v2526_v9  ;;  %v2418_v11 = vunpack.c.h.bf16 %v2526_v9  ;;  %v2421_v1 = vunpack.c.l.bf16 %v2527_v19  ;;  %v2422_v45 = vunpack.c.h.bf16 %v2527_v19 }
 0x124   : > { %v2425_v17 = vunpack.c.l.bf16 %v2528_v13  ;;  %v2426_v29 = vunpack.c.h.bf16 %v2528_v13  ;;  %v2429_v3 = vunpack.c.l.bf16 %v2529_v33  ;;  %v2430_v40 = vunpack.c.h.bf16 %v2529_v33  ;;  %v2538_v13 = vld [vmem:[%s3083_s10 + $0xf8] sm:$0xff]  }
 0x125   : > { %v2433_v10 = vunpack.c.l.bf16 %v2530_v30  ;;  %v2434_v44 = vunpack.c.h.bf16 %v2530_v30  ;;  %v1790_v41 = vsub.f32 %v2405_v8, %v2421_v1  ;;  %v1791_v31 = vsub.f32 %v2406_v6, %v2422_v45 }
 0x126   : > { %v1792_v25 = vsub.f32 %v2409_v49, %v2425_v17  ;;  %v1793_v43 = vsub.f32 %v2410_v5, %v2426_v29  ;;  %v1794_v22 = vsub.f32 %v2413_v54, %v2429_v3  ;;  %v1795_v46 = vsub.f32 %v2414_v53, %v2430_v40  ;;  %v1890_v3 = vld [vmem:[%s3079_s8] sm:$0xff]  ;;  %v1891_v40 = vld [vmem:[%s3079_s8 + $0x8] sm:$0xff] }
 0x127   : > { %v1796_v15 = vsub.f32 %v2417_v50, %v2433_v10  ;;  %v1797_v12 = vsub.f32 %v2418_v11, %v2434_v44  ;;  %v1798_v14 = vand.u32 2147483647, %v1790_v41  ;;  %v1799_v52 = vand.u32 2147483647, %v1791_v31 }
 0x128   : > { %v1800_v28 = vand.u32 2147483647, %v1792_v25  ;;  %v1801_v7 = vand.u32 2147483647, %v1793_v43  ;;  %v1802_v27 = vand.u32 2147483647, %v1794_v22  ;;  %v2437_v63 = vunpack.c.l.bf16 %v2531_v20 }
 0x129   : > { %v1803_v2 = vand.u32 2147483647, %v1795_v46  ;;  %v1804_v16 = vand.u32 2147483647, %v1796_v15  ;;  %v1805_v38 = vand.u32 2147483647, %v1797_v12  ;;  %v1806_v37 = vadd.f32 %v1798_v14, %v1748_v59 }
 0x12a   : > { %v1807_v58 = vadd.f32 %v1799_v52, %v1749_v18  ;;  %v1808_v51 = vadd.f32 %v1800_v28, %v1750_v60  ;;  %v1809_v55 = vadd.f32 %v1801_v7, %v1751_v0  ;;  %v1810_v56 = vadd.f32 %v1802_v27, %v1752_v32  ;;  %v2154_v52 = vld [vmem:[%s3079_s8 + $0x10] sm:$0xff] }
 0x12b   : > { %v1811_v42 = vadd.f32 %v1803_v2, %v1753_v36  ;;  %v1812_v24 = vadd.f32 %v1804_v16, %v1754_v23  ;;  %v1813_v39 = vadd.f32 %v1805_v38, %v1755_v21  ;;  %v2438_v8 = vunpack.c.h.bf16 %v2531_v20  ;;  %v2159_v2 = vld [vmem:[%s3079_s8 + $0x28] sm:$0xff] }
 0x12c   : > { %v2441_v47 = vunpack.c.l.bf16 %v2532_v4  ;;  %v2442_v9 = vunpack.c.h.bf16 %v2532_v4  ;;  %v2445_v19 = vunpack.c.l.bf16 %v2533_v35  ;;  %v2446_v6 = vunpack.c.h.bf16 %v2533_v35  ;;  %v2155_v4 = vld [vmem:[%s3079_s8 + $0x18] sm:$0xff] }
 0x12d   : > { %v2449_v59 = vunpack.c.l.bf16 %v2534_v61  ;;  %v2450_v18 = vunpack.c.h.bf16 %v2534_v61  ;;  %v2453_v33 = vunpack.c.l.bf16 %v2535_v48  ;;  %v2454_v60 = vunpack.c.h.bf16 %v2535_v48  ;;  %v3686_v61 = vld [vmem:[#allocation7_spill] sm:$0xff]  ;;  %v3688_v48 = vld [vmem:[#allocation10_spill] sm:$0xff] }
 0x12e   : > { %v2457_v0 = vunpack.c.l.bf16 %v2536_v62  ;;  %v2458_v32 = vunpack.c.h.bf16 %v2536_v62  ;;  %v2461_v49 = vunpack.c.l.bf16 %v2537_v26  ;;  %v2462_v36 = vunpack.c.h.bf16 %v2537_v26 }
 0x12f   : > { %v2465_v23 = vunpack.c.l.bf16 %v2538_v13  ;;  %v2466_v21 = vunpack.c.h.bf16 %v2538_v13  ;;  %v1848_v5 = vsub.f32 %v2437_v63, %v2453_v33  ;;  %v1849_v54 = vsub.f32 %v2438_v8, %v2454_v60  ;;  %v2158_v63 = vld [vmem:[%s3079_s8 + $0x20] sm:$0xff]  ;;  %v2163_v13 = vld [vmem:[%s3079_s8 + $0x38] sm:$0xff] }
 0x130   : > { %v1850_v53 = vsub.f32 %v2441_v47, %v2457_v0  ;;  %v1851_v30 = vsub.f32 %v2442_v9, %v2458_v32  ;;  %v1852_v50 = vsub.f32 %v2445_v19, %v2461_v49  ;;  %v1853_v11 = vsub.f32 %v2446_v6, %v2462_v36  ;;  %v2162_v6 = vld [vmem:[%s3079_s8 + $0x30] sm:$0xff] }
 0x131   : > { %v1854_v1 = vsub.f32 %v2449_v59, %v2465_v23  ;;  %v1855_v45 = vsub.f32 %v2450_v18, %v2466_v21  ;;  %v1856_v17 = vand.u32 2147483647, %v1848_v5  ;;  %v1857_v29 = vand.u32 2147483647, %v1849_v54 }
 0x132   : > { %v1858_v10 = vand.u32 2147483647, %v1850_v53  ;;  %v1859_v44 = vand.u32 2147483647, %v1851_v30  ;;  %v1860_v41 = vand.u32 2147483647, %v1852_v50  ;;  %v1876_v31 = vstv %s1873_s0 }
 0x133   : > { %v1861_v20 = vand.u32 2147483647, %v1853_v11  ;;  %v1862_v25 = vand.u32 2147483647, %v1854_v1  ;;  %v1863_v43 = vand.u32 2147483647, %v1855_v45  ;;  %v1864_v22 = vadd.f32 %v1856_v17, %v1806_v37 }
 0x134   : > { %v1865_v46 = vadd.f32 %v1857_v29, %v1807_v58  ;;  %v1866_v15 = vadd.f32 %v1858_v10, %v1808_v51  ;;  %v1867_v12 = vadd.f32 %v1859_v44, %v1809_v55  ;;  %v1868_v14 = vadd.f32 %v1860_v41, %v1810_v56  ;;  %v3687_v58 = vld [vmem:[#allocation8_spill] sm:$0xff] }
 0x135   : > { %v1869_v35 = vadd.f32 %v1861_v20, %v1811_v42  ;;  %v1870_v28 = vadd.f32 %v1862_v25, %v1812_v24  ;;  %v1871_v7 = vadd.f32 %v1863_v43, %v1813_v39  ;;  %v1885_v27 = vstv %s1882_s11  ;;  %v3689_v24 = vld [vmem:[#allocation11_spill] sm:$0xff] }
 0x136   : > { %v1874_v16 = vadd.f32 %v1866_v15, %v1864_v22  ;;  %v1875_v38 = vadd.f32 %v1867_v12, %v1865_v46  ;;  %v1892_v37 = vadd.f32 %v1890_v3, %v3686_v61  ;;  %v1893_v51 = vadd.f32 %v1891_v40, %v3687_v58 }
 0x137   : > { %v1883_v55 = vadd.f32 %v1870_v28, %v1868_v14  ;;  %v1884_v56 = vadd.f32 %v1871_v7, %v1869_v35  ;;  %v1899_v42 = vadd.f32 %v2154_v52, %v3688_v48  ;;  %v1900_v39 = vadd.f32 %v2155_v4, %v3689_v24 }
 0x138   : > { %v1877_v8 = vmul.f32 %v1876_v31, %v1874_v16  ;;  %v1878_v62 = vmul.f32 %v1876_v31, %v1875_v38  ;;  %1894 = vst [vmem:[%s3079_s8] sm:$0xff] %v1892_v37  ;;  %1895 = vst [vmem:[%s3079_s8 + $0x8] sm:$0xff] %v1893_v51  ;;  %v1906_v26 = vadd.f32 %v2158_v63, %v3584_v34 }
 0x139   : > { %v1907_v47 = vadd.f32 %v2159_v2, %v3589_v57  ;;  %v1886_v9 = vmul.f32 %v1885_v27, %v1883_v55  ;;  %v1887_v19 = vmul.f32 %v1885_v27, %v1884_v56  ;;  %2156 = vst [vmem:[%s3079_s8 + $0x10] sm:$0xff] %v1899_v42  ;;  %2157 = vst [vmem:[%s3079_s8 + $0x18] sm:$0xff] %v1900_v39 }
 0x13a   : > { %2160 = vst [vmem:[%s3079_s8 + $0x20] sm:$0xff] %v1906_v26 }
 0x13b   : > { %2161 = vst [vmem:[%s3079_s8 + $0x28] sm:$0xff] %v1907_v47  ;;  %v1888_v59 = vadd.f32 %v1886_v9, %v1877_v8  ;;  %v1889_v18 = vadd.f32 %v1887_v19, %v1878_v62 }
 0x13d   : > { %v1913_v33 = vadd.f32 %v2162_v6, %v1888_v59  ;;  %v1914_v60 = vadd.f32 %v2163_v13, %v1889_v18 }
 0x13f   : > { %2164 = vst [vmem:[%s3079_s8 + $0x30] sm:$0xff] %v1913_v33  ;;  %2165 = vst [vmem:[%s3079_s8 + $0x38] sm:$0xff] %v1914_v60 }
 0x140 PF: > { %s19_s22 = sadd.s32 1, %s2812_s22   ;;  %s3690_s17 = smov %s2792_s18 }
 0x141   : > { %p16_p3 = scmp.ge.s32.totalorder %s19_s22, 8   ;;  %s3691_s18 = smov %s2898_s5 }
 0x142   : > { %s3692_s19 = smov %s2804_s20  ;;  %s3693_s0 = smov %s2808_s21 }
 0x143   : > { %s3694_s20 = smov %s3697_s23  ;;  %s3695_s21 = smov %s3701_s24 }
 0x144   :  { %18 = sbr.rel (!%p16_p3) target bundleno = 19 (0x13), region = 173 }

</bundles_post_ra>
